<compile_context>
chip_gen: v7x
topology: tpu7x:2x2x1
jax: 0.10.0
libtpu: 0.0.40
codegen_flags: <defaults>
</compile_context>

<pallas_src>
import functools

import jax
import jax.numpy as jnp
import numpy as np
from jax.experimental import pallas as pl
from jax.experimental.pallas import tpu as pltpu


# ------------------------------------------------------------------------------
# Hardware-dependent defaults.
# ------------------------------------------------------------------------------
def _device_kind():
    try:
        return jax.devices()[0].device_kind.lower()
    except Exception:
        return ""


def _vmem_limit_bytes(kind):
    # v7x: 64 MiB physical VMEM per TensorCore -> stay well under it.
    if "v7" in kind or "tpu7" in kind or "7x" in kind:
        return 48 * 1024 * 1024
    # v4 / v5e / v5p / v6e: 128 MiB physical.
    if "v4" in kind or "v5" in kind or "v6" in kind:
        return 96 * 1024 * 1024
    return None  # unknown chip: keep the compiler default, be conservative.


def _default_compute_dtype(kind):
    # v6e/v7x have bf16 VPU/EUP: bf16 elementwise halves VALU/EUP op counts and
    # intermediate VMEM.  v5e and older have no bf16 vector units: stay f32.
    if "v6" in kind or "v7" in kind or "tpu7" in kind or "7x" in kind:
        return jnp.bfloat16
    return jnp.float32


def _compiler_params(semantics, vmem_limit):
    if vmem_limit is None:
        return pltpu.CompilerParams(dimension_semantics=semantics)
    return pltpu.CompilerParams(dimension_semantics=semantics,
                                vmem_limit_bytes=vmem_limit)


# ------------------------------------------------------------------------------
# Kernel A (main path): streamed single-read kernel, NCHW layout, grid=(B, T).
# ------------------------------------------------------------------------------
def _magf_streamed_kernel(x_ref, w1t_ref, b1_ref, w2_ref, b2_ref, wgl_ref,
                          bias_ref, out_ref, slab_ref, ssum_ref, *,
                          hw, chunk, n_chunks, inv_hw, matmul_dtype,
                          compute_dtype):
    t = pl.program_id(1)
    tail = hw - (n_chunks - 1) * chunk            # static, 0 < tail <= chunk

    @pl.when(t == 0)
    def _():
        ssum_ref[...] = jnp.zeros_like(ssum_ref)

    xc = x_ref[...]                               # (C, chunk), input dtype
    slab_ref[t] = xc                              # stash for the fuse phase

    # SE squeeze: accumulate the spatial sum.  Only the valid columns of the
    # (possibly OOB-padded) tail chunk contribute.
    if tail == chunk:
        ssum_ref[...] += jnp.sum(xc.astype(jnp.float32), axis=1, keepdims=True)
    else:
        @pl.when(t < n_chunks - 1)
        def _():
            ssum_ref[...] += jnp.sum(xc.astype(jnp.float32), axis=1,
                                     keepdims=True)

        @pl.when(t == n_chunks - 1)
        def _():
            ssum_ref[...] += jnp.sum(xc[:, :tail].astype(jnp.float32),
                                     axis=1, keepdims=True)

    @pl.when(t == n_chunks - 1)
    def _():
        # --- SE excitation (C -> C//16 -> C); tiny, done as broadcast+reduce
        #     so it never touches degenerate N=1 MXU shapes.
        y = ssum_ref[...] * inv_hw                                        # (C, 1)
        h = jnp.maximum(
            jnp.sum(w1t_ref[...] * y, axis=0, keepdims=True) + b1_ref[...],
            0.0)                                                          # (1, hid)
        z = jax.nn.sigmoid(
            jnp.sum(w2_ref[...] * h, axis=1, keepdims=True) + b2_ref[...])  # (C, 1)
        zc = z.astype(compute_dtype)

        wgl = wgl_ref[...]                                                # (C, C)
        bias = bias_ref[...]                                              # (C, 1) f32

        # --- Radar-gated fusion, chunk by chunk: keeps every intermediate
        #     chunk-sized instead of slab-sized.  Static unroll over the
        #     VMEM-resident slab (n_chunks is capped at ~16 by chunk sizing).
        for j in range(n_chunks):
            xs = slab_ref[j].astype(compute_dtype) * zc                   # (C, chunk)
            g = jnp.dot(wgl, xs.astype(matmul_dtype),
                        preferred_element_type=jnp.float32)               # f32 accum
            g = jax.nn.sigmoid((g + bias).astype(compute_dtype))
            o = (xs * (1.0 + g)).astype(out_ref.dtype)
            lo = j * chunk
            size = min(chunk, hw - lo)                                    # static
            out_ref[:, lo:lo + size] = o[:, :size]


def _pick_chunk(hw, chunk_target, max_chunks=16):
    """Chunk size along H*W: multiple of 128 when tiling, <= max_chunks chunks."""
    if hw <= chunk_target:
        return hw, 1
    chunk = max(chunk_target, -(-hw // max_chunks))
    chunk = -(-chunk // 128) * 128
    return chunk, -(-hw // chunk)


def _streamed_vmem_estimate(C, hw, chunk, n_chunks, x_itemsize, out_itemsize,
                            param_bytes, compute_itemsize):
    slab = n_chunks * chunk * C * x_itemsize          # persistent VMEM scratch slab
    out_bufs = 2 * hw * C * out_itemsize              # double-buffered output slab
    in_bufs = 2 * chunk * C * x_itemsize              # double-buffered input chunk
    work = 6 * chunk * C * max(4, compute_itemsize)   # per-chunk intermediates
    return slab + out_bufs + in_bufs + 2 * param_bytes + work + (2 << 20)


def _magf_streamed(x, w1t, b1_row, w2, b2_col, wgl_mm, bias_col, *,
                   chunk, n_chunks, matmul_dtype, compute_dtype, vmem_limit):
    B, C, HW = x.shape
    se_hid = w1t.shape[1]
    kern = functools.partial(
        _magf_streamed_kernel, hw=HW, chunk=chunk, n_chunks=n_chunks,
        inv_hw=1.0 / HW, matmul_dtype=matmul_dtype, compute_dtype=compute_dtype)
    return pl.pallas_call(
        kern,
        out_shape=jax.ShapeDtypeStruct((B, C, HW), x.dtype),
        grid_spec=pltpu.PrefetchScalarGridSpec(
            num_scalar_prefetch=0,
            grid=(B, n_chunks),
            in_specs=[
                pl.BlockSpec((None, C, chunk), lambda b, t: (b, 0, t)),   # F_L chunk
                pl.BlockSpec((C, se_hid), lambda b, t: (0, 0)),           # SE W1^T
                pl.BlockSpec((1, se_hid), lambda b, t: (0, 0)),           # SE b1
                pl.BlockSpec((C, se_hid), lambda b, t: (0, 0)),           # SE W2
                pl.BlockSpec((C, 1), lambda b, t: (0, 0)),                # SE b2
                pl.BlockSpec((C, C), lambda b, t: (0, 0)),                # WgL
                pl.BlockSpec((None, C, 1), lambda b, t: (b, 0, 0)),       # gate bias
            ],
            out_specs=pl.BlockSpec((None, C, HW), lambda b, t: (b, 0, 0)),
            scratch_shapes=[
                pltpu.VMEM((n_chunks, C, chunk), x.dtype),                # slab stash
                pltpu.VMEM((C, 1), jnp.float32),                          # squeeze sum
            ]),
        compiler_params=_compiler_params(("parallel", "arbitrary"), vmem_limit),
    )(x, w1t, b1_row, w2, b2_col, wgl_mm, bias_col)


# ------------------------------------------------------------------------------
# Kernels B/C (fallback for VMEM-oversized slabs): two-pass, pixel-tiled, NCHW.
# ------------------------------------------------------------------------------
def _squeeze_kernel(x_ref, out_ref, *, hw, tile_hw):
    t = pl.program_id(1)

    @pl.when(t == 0)
    def _():
        out_ref[...] = jnp.zeros_like(out_ref)

    x = x_ref[0].astype(jnp.float32)                               # (C, tile_hw)
    # Mask the (possibly partial) tail tile so no pixels are dropped / doubled.
    lane = jax.lax.broadcasted_iota(jnp.int32, x.shape, 1)
    x = jnp.where(t * tile_hw + lane < hw, x, 0.0)
    out_ref[...] += jnp.sum(x, axis=1, keepdims=True)[None]


def _fuse_kernel(x_ref, z_ref, wgl_ref, bias_ref, out_ref, *, matmul_dtype,
                 compute_dtype):
    xs = x_ref[0].astype(compute_dtype) * z_ref[0].astype(compute_dtype)
    g = jnp.dot(wgl_ref[...], xs.astype(matmul_dtype),
                preferred_element_type=jnp.float32)
    g = jax.nn.sigmoid((g + bias_ref[0]).astype(compute_dtype))
    out_ref[0] = (xs * (1.0 + g)).astype(out_ref.dtype)


def _clamp_tile(tile_hw, hw):
    tile_hw = min(tile_hw, hw)
    if tile_hw < hw and tile_hw % 128 != 0:
        raise ValueError("tile_hw must be a multiple of 128 when tiling H*W")
    return tile_hw


def _se_squeeze(x, tile_hw, vmem_limit):
    """Spatial mean in NCHW layout: [B, C, HW] -> [B, C] float32."""
    B, C, HW = x.shape
    tile_hw = _clamp_tile(tile_hw, HW)
    kern = functools.partial(_squeeze_kernel, hw=HW, tile_hw=tile_hw)
    sums = pl.pallas_call(
        kern,
        out_shape=jax.ShapeDtypeStruct((B, C, 1), jnp.float32),
        grid_spec=pltpu.PrefetchScalarGridSpec(
            num_scalar_prefetch=0,
            grid=(B, pl.cdiv(HW, tile_hw)),
            in_specs=[pl.BlockSpec((1, C, tile_hw), lambda b, t: (b, 0, t))],
            out_specs=pl.BlockSpec((1, C, 1), lambda b, t: (b, 0, 0)),
        ),
        compiler_params=_compiler_params(("parallel", "arbitrary"), vmem_limit),
    )(x)
    return sums[:, :, 0] * (1.0 / HW)


def _magf_fuse(x, z_col, wgl_mm, bias_col, tile_hw, matmul_dtype, compute_dtype,
               vmem_limit):
    B, C, HW = x.shape
    tile_hw = _clamp_tile(tile_hw, HW)
    kern = functools.partial(_fuse_kernel, matmul_dtype=matmul_dtype,
                             compute_dtype=compute_dtype)
    return pl.pallas_call(
        kern,
        out_shape=jax.ShapeDtypeStruct((B, C, HW), x.dtype),
        grid_spec=pltpu.PrefetchScalarGridSpec(
            num_scalar_prefetch=0,
            grid=(B, pl.cdiv(HW, tile_hw)),
            in_specs=[
                pl.BlockSpec((1, C, tile_hw), lambda b, t: (b, 0, t)),   # F_L
                pl.BlockSpec((1, C, 1), lambda b, t: (b, 0, 0)),         # SE scale
                pl.BlockSpec((C, C), lambda b, t: (0, 0)),               # WgL
                pl.BlockSpec((1, C, 1), lambda b, t: (b, 0, 0)),         # gate bias
            ],
            out_specs=pl.BlockSpec((1, C, tile_hw), lambda b, t: (b, 0, t)),
        ),
        compiler_params=_compiler_params(("parallel", "parallel"), vmem_limit),
    )(x, z_col, wgl_mm, bias_col)


# --------------------------------- MAGF forward ---------------------------------
def _linear(x, w, b):
    # PyTorch nn.Linear: y = x @ W^T + b, weight shape [out, in]
    return x @ w.T + b


def magf_forward(params, F_L, F_sa, F_fp, *,
                 matmul_dtype=jnp.bfloat16,
                 compute_dtype=None,
                 chunk_target=1024,
                 tile_hw=1024,
                 force_fallback=False):
    kind = _device_kind()
    vmem_limit = _vmem_limit_bytes(kind)
    vmem_budget = vmem_limit if vmem_limit is not None else 12 * 1024 * 1024
    if compute_dtype is None:
        compute_dtype = _default_compute_dtype(kind)

    B, C, H, W = F_L.shape
    HW = H * W
    x = F_L.reshape(B, C, HW)     # free reshape; stays NCHW (C->sublanes, pixels->lanes)

    # ---- radar branch: tiny [1, rf] / [1, C] vectors -> plain-JAX glue ----
    sa_e = _linear(jax.nn.relu(_linear(jnp.mean(F_sa, axis=1),
                                       params["sa_w1"], params["sa_b1"])),
                   params["sa_w2"], params["sa_b2"])
    fp_e = _linear(jax.nn.relu(_linear(jnp.mean(F_fp, axis=1),
                                       params["fp_w1"], params["fp_b1"])),
                   params["fp_w2"], params["fp_b2"])
    lam = params["our_lambda"]
    radar = jnp.broadcast_to(lam * sa_e + (1.0 - lam) * fp_e, (B, C))    # expand(B, C)

    # ---- split the 1x1 gate conv over cat([F_L_se, radar_2d]):
    #      gate = sigmoid(WgL @ F_L_se + (WgR @ radar + bg)); the radar part is
    #      spatially constant -> folded into a per-batch bias column. ----
    wg = params["gate_w"][:, :, 0, 0]                                    # (C, 2C)
    wgl = wg[:, :C]                                                      # lidar half
    wgr = wg[:, C:]                                                      # radar half
    gate_bias = (radar @ wgr.T + params["gate_b"][None, :]).astype(jnp.float32)
    bias_col = gate_bias.reshape(B, C, 1)
    wgl_mm = wgl.astype(matmul_dtype)                                    # MXU operand

    # SE params, prepared for the in-kernel excitation.
    se_hid = params["se_w1"].shape[0]
    se_w1t = params["se_w1"].T.astype(jnp.float32)                       # (C, C//16)
    se_b1 = params["se_b1"].reshape(1, se_hid).astype(jnp.float32)
    se_w2 = params["se_w2"].astype(jnp.float32)                          # (C, C//16)
    se_b2 = params["se_b2"].reshape(C, 1).astype(jnp.float32)

    chunk, n_chunks = _pick_chunk(HW, chunk_target)
    param_bytes = sum(int(a.size) * a.dtype.itemsize
                      for a in (se_w1t, se_b1, se_w2, se_b2, wgl_mm, bias_col))
    est = _streamed_vmem_estimate(C, HW, chunk, n_chunks,
                                  x.dtype.itemsize, x.dtype.itemsize,
                                  param_bytes, jnp.dtype(compute_dtype).itemsize)

    if (not force_fallback) and est <= vmem_budget:
        # Single-read streamed path: F_L read from HBM once and written once.
        out = _magf_streamed(x, se_w1t, se_b1, se_w2, se_b2, wgl_mm, bias_col,
                             chunk=chunk, n_chunks=n_chunks,
                             matmul_dtype=matmul_dtype,
                             compute_dtype=compute_dtype,
                             vmem_limit=vmem_limit)
    else:
        # Two-pass fallback for slabs that do not fit VMEM (reads F_L twice).
        y = _se_squeeze(x, tile_hw, vmem_limit)                          # [B, C]
        h = jax.nn.relu(_linear(y, params["se_w1"], params["se_b1"]))
        z = jax.nn.sigmoid(_linear(h, params["se_w2"], params["se_b2"]))
        out = _magf_fuse(x, z.reshape(B, C, 1).astype(jnp.float32),
                         wgl_mm, bias_col, tile_hw, matmul_dtype,
                         compute_dtype, vmem_limit)

    return out.reshape(B, C, H, W)                                       # NCHW

# --------------------------- pure-JAX reference (check) --------------------------
def magf_reference(params, F_L, F_sa, F_fp):
    B, C, H, W = F_L.shape
    y = jnp.mean(F_L, axis=(2, 3))                                       # [B, C]
    h = jax.nn.relu(_linear(y, params["se_w1"], params["se_b1"]))
    z = jax.nn.sigmoid(_linear(h, params["se_w2"], params["se_b2"]))
    F_L_se = F_L * z[:, :, None, None]
    sa_e = _linear(jax.nn.relu(_linear(jnp.mean(F_sa, 1), params["sa_w1"], params["sa_b1"])),
                   params["sa_w2"], params["sa_b2"])
    fp_e = _linear(jax.nn.relu(_linear(jnp.mean(F_fp, 1), params["fp_w1"], params["fp_b1"])),
                   params["fp_w2"], params["fp_b2"])
    lam = params["our_lambda"]
    radar = jnp.broadcast_to(lam * sa_e + (1.0 - lam) * fp_e, (B, C))
    radar_2d = jnp.broadcast_to(radar[:, :, None, None], (B, C, H, W))
    fuse_in = jnp.concatenate([F_L_se, radar_2d], axis=1)                # [B, 2C, H, W]
    wg = params["gate_w"][:, :, 0, 0]                                    # [C, 2C]
    gate = jax.nn.sigmoid(
        jnp.einsum("bihw,oi->bohw", fuse_in, wg) + params["gate_b"][None, :, None, None])
    return F_L_se + gate * F_L_se


# ------------------------------------ main ---------------------------------------
if __name__ == "__main__":
    B, C, H, W = 2, 128, 16, 16           # lidar feature map (small demo)
    RF, N = 32, 8                         # radar_feat_dim, radar points
    HID = 128                             # fc hidden (fixed in the module)
    SE_HID = C // 16

    key = jax.random.PRNGKey(0)
    ks = jax.random.split(key, 18)
    s = 0.05
    params = {
        "our_lambda": jnp.float32(0.5),
        "se_w1": jax.random.normal(ks[0], (SE_HID, C), jnp.float32) * s,
        "se_b1": jax.random.normal(ks[1], (SE_HID,), jnp.float32) * s,
        "se_w2": jax.random.normal(ks[2], (C, SE_HID), jnp.float32) * s,
        "se_b2": jax.random.normal(ks[3], (C,), jnp.float32) * s,
        "sa_w1": jax.random.normal(ks[4], (HID, RF), jnp.float32) * s,
        "sa_b1": jax.random.normal(ks[5], (HID,), jnp.float32) * s,
        "sa_w2": jax.random.normal(ks[6], (C, HID), jnp.float32) * s,
        "sa_b2": jax.random.normal(ks[7], (C,), jnp.float32) * s,
        "fp_w1": jax.random.normal(ks[8], (HID, RF), jnp.float32) * s,
        "fp_b1": jax.random.normal(ks[9], (HID,), jnp.float32) * s,
        "fp_w2": jax.random.normal(ks[10], (C, HID), jnp.float32) * s,
        "fp_b2": jax.random.normal(ks[11], (C,), jnp.float32) * s,
        "gate_w": jax.random.normal(ks[12], (C, 2 * C, 1, 1), jnp.float32) * s,
        "gate_b": jax.random.normal(ks[13], (C,), jnp.float32) * s,
    }

    F_L = jax.random.normal(ks[14], (B, C, H, W), jnp.float32)
    kr = jax.random.split(ks[15], 2)
    F_sa = jax.random.normal(kr[0], (1, N, RF), jnp.float32)
    F_fp = jax.random.normal(kr[1], (1, N, RF), jnp.float32)

    ref = jax.block_until_ready(magf_reference(params, F_L, F_sa, F_fp))

    # 1) default perf config: streamed path, bf16 MXU, per-chip elementwise dtype.
    out = jax.block_until_ready(magf_forward(params, F_L, F_sa, F_fp))
    np.testing.assert_allclose(np.asarray(out), np.asarray(ref), rtol=3e-2, atol=3e-2)

    # 2) streamed path with f32 everywhere: exactness of the decomposition.
    out32 = jax.block_until_ready(
        magf_forward(params, F_L, F_sa, F_fp,
                     matmul_dtype=jnp.float32, compute_dtype=jnp.float32))
    np.testing.assert_allclose(np.asarray(out32), np.asarray(ref), rtol=1e-4, atol=1e-4)

    # 3) streamed path with multiple chunks and a partial tail chunk
    #    (H*W = 384, chunk 256 -> 2 chunks, tail 128), f32 for a tight check.
    H3, W3 = 16, 24
    F_L3 = jax.random.normal(ks[17], (B, C, H3, W3), jnp.float32)
    ref3 = jax.block_until_ready(magf_reference(params, F_L3, F_sa, F_fp))
    out3 = jax.block_until_ready(
        magf_forward(params, F_L3, F_sa, F_fp, matmul_dtype=jnp.float32,
                     compute_dtype=jnp.float32, chunk_target=256))
    np.testing.assert_allclose(np.asarray(out3), np.asarray(ref3), rtol=1e-4, atol=1e-4)

    # 4) two-pass fallback, forced, on a non-128-divisible H*W (exercises the
    #    cdiv grid + tail masking), f32 for a tight check.
    H2, W2 = 12, 15
    F_L2 = jax.random.normal(ks[16], (B, C, H2, W2), jnp.float32)
    ref2 = jax.block_until_ready(magf_reference(params, F_L2, F_sa, F_fp))
    out2 = jax.block_until_ready(
        magf_forward(params, F_L2, F_sa, F_fp, matmul_dtype=jnp.float32,
                     compute_dtype=jnp.float32, tile_hw=128, force_fallback=True))
    np.testing.assert_allclose(np.asarray(out2), np.asarray(ref2), rtol=1e-4, atol=1e-4)

    print("KERNEL_OK")
</pallas_src>

<mosaic_0001>
module attributes {stable_mosaic.version = 11 : i64} {
  func.func @_magf_streamed_kernel(%arg0: i32, %arg1: i32, %arg2: memref<1x128x256xf32, #tpu.memory_space<vmem>>, %arg3: memref<128x8xf32, #tpu.memory_space<vmem>>, %arg4: memref<1x8xf32, #tpu.memory_space<vmem>>, %arg5: memref<128x8xf32, #tpu.memory_space<vmem>>, %arg6: memref<128x1xf32, #tpu.memory_space<vmem>>, %arg7: memref<128x128xbf16, #tpu.memory_space<vmem>>, %arg8: memref<1x128x1xf32, #tpu.memory_space<vmem>>, %arg9: memref<1x128x256xf32, #tpu.memory_space<vmem>>, %arg10: memref<1x128x256xf32, #tpu.memory_space<vmem>>, %arg11: memref<128x1xf32, #tpu.memory_space<vmem>>) attributes {dimension_semantics = [#tpu.dimension_semantics<parallel>, #tpu.dimension_semantics<arbitrary>], iteration_bounds = array<i64: 2, 1>, scalar_prefetch = 0 : i64, scratch_operands = 2 : i64, tpu.core_type = #tpu.core_type<tc>, window_params = [{transform_indices = @transform_0, window_bounds = array<i64: 1, 128, 256>}, {pipeline_mode = #tpu.pipeline_mode<synchronous>, transform_indices = @transform_1, window_bounds = array<i64: 128, 8>}, {pipeline_mode = #tpu.pipeline_mode<synchronous>, transform_indices = @transform_2, window_bounds = array<i64: 1, 8>}, {pipeline_mode = #tpu.pipeline_mode<synchronous>, transform_indices = @transform_3, window_bounds = array<i64: 128, 8>}, {pipeline_mode = #tpu.pipeline_mode<synchronous>, transform_indices = @transform_4, window_bounds = array<i64: 128, 1>}, {pipeline_mode = #tpu.pipeline_mode<synchronous>, transform_indices = @transform_5, window_bounds = array<i64: 128, 128>}, {transform_indices = @transform_6, window_bounds = array<i64: 1, 128, 1>}, {transform_indices = @transform_7, window_bounds = array<i64: 1, 128, 256>}]} {
    %c0_i32 = arith.constant 0 : i32
    %0 = arith.cmpi eq, %arg1, %c0_i32 : i32
    %1 = arith.extui %0 : i1 to i32
    %c0_i32_0 = arith.constant 0 : i32
    %2 = arith.cmpi ne, %1, %c0_i32_0 : i32
    scf.if %2 {
      %cst_11 = arith.constant 0.000000e+00 : f32
      %17 = vector.broadcast %cst_11 : f32 to vector<128x1xf32>
      %c0_12 = arith.constant 0 : index
      %c0_13 = arith.constant 0 : index
      %18 = vector.load %arg11[%c0_12, %c0_13] : memref<128x1xf32, #tpu.memory_space<vmem>>, vector<128x1xf32>
      tpu.vector_store %arg11[%c0_12, %c0_13], %17 {strides = array<i32>} : memref<128x1xf32, #tpu.memory_space<vmem>>, vector<128x1xf32>,
    } else {
    }
    %c0 = arith.constant 0 : index
    %c0_1 = arith.constant 0 : index
    %c0_2 = arith.constant 0 : index
    %3 = vector.load %arg2[%c0, %c0_1, %c0_2] : memref<1x128x256xf32, #tpu.memory_space<vmem>>, vector<1x128x256xf32>
    %4 = vector.shape_cast %3 : vector<1x128x256xf32> to vector<128x256xf32>
    %5 = arith.index_cast %arg1 : i32 to index
    %c0_3 = arith.constant 0 : index
    %c0_4 = arith.constant 0 : index
    %6 = vector.load %arg10[%5, %c0_3, %c0_4] : memref<1x128x256xf32, #tpu.memory_space<vmem>>, vector<1x128x256xf32>
    %7 = vector.shape_cast %6 : vector<1x128x256xf32> to vector<128x256xf32>
    %8 = vector.shape_cast %4 : vector<128x256xf32> to vector<1x128x256xf32>
    tpu.vector_store %arg10[%5, %c0_3, %c0_4], %8 {strides = array<i32>} : memref<1x128x256xf32, #tpu.memory_space<vmem>>, vector<1x128x256xf32>,
    %c0_5 = arith.constant 0 : index
    %c0_6 = arith.constant 0 : index
    %9 = vector.load %arg11[%c0_5, %c0_6] : memref<128x1xf32, #tpu.memory_space<vmem>>, vector<128x1xf32>
    %cst = arith.constant dense<0.000000e+00> : vector<128xf32>
    %10 = vector.multi_reduction <add>, %4, %cst [1] : vector<128x256xf32> to vector<128xf32>
    %11 = vector.shape_cast %10 : vector<128xf32> to vector<128x1xf32>
    %12 = arith.addf %9, %11 : vector<128x1xf32>
    %c0_7 = arith.constant 0 : index
    %c0_8 = arith.constant 0 : index
    %13 = vector.load %arg11[%c0_7, %c0_8] : memref<128x1xf32, #tpu.memory_space<vmem>>, vector<128x1xf32>
    tpu.vector_store %arg11[%c0_7, %c0_8], %12 {strides = array<i32>} : memref<128x1xf32, #tpu.memory_space<vmem>>, vector<128x1xf32>,
    %c0_i32_9 = arith.constant 0 : i32
    %14 = arith.cmpi eq, %arg1, %c0_i32_9 : i32
    %15 = arith.extui %14 : i1 to i32
    %c0_i32_10 = arith.constant 0 : i32
    %16 = arith.cmpi ne, %15, %c0_i32_10 : i32
    scf.if %16 {
      %c0_11 = arith.constant 0 : index
      %c0_12 = arith.constant 0 : index
      %17 = vector.load %arg11[%c0_11, %c0_12] : memref<128x1xf32, #tpu.memory_space<vmem>>, vector<128x1xf32>
      %cst_13 = arith.constant 3.906250e-03 : f32
      %18 = vector.broadcast %cst_13 : f32 to vector<128x1xf32>
      %19 = arith.mulf %17, %18 : vector<128x1xf32>
      %c0_14 = arith.constant 0 : index
      %c0_15 = arith.constant 0 : index
      %20 = vector.load %arg3[%c0_14, %c0_15] : memref<128x8xf32, #tpu.memory_space<vmem>>, vector<128x8xf32>
      %21 = vector.broadcast %19 : vector<128x1xf32> to vector<128x8xf32>
      %22 = arith.mulf %20, %21 : vector<128x8xf32>
      %cst_16 = arith.constant dense<0.000000e+00> : vector<8xf32>
      %23 = vector.multi_reduction <add>, %22, %cst_16 [0] : vector<128x8xf32> to vector<8xf32>
      %24 = vector.shape_cast %23 : vector<8xf32> to vector<1x8xf32>
      %c0_17 = arith.constant 0 : index
      %c0_18 = arith.constant 0 : index
      %25 = vector.load %arg4[%c0_17, %c0_18] : memref<1x8xf32, #tpu.memory_space<vmem>>, vector<1x8xf32>
      %26 = arith.addf %24, %25 : vector<1x8xf32>
      %cst_19 = arith.constant 0.000000e+00 : f32
      %27 = vector.broadcast %cst_19 : f32 to vector<1x8xf32>
      %28 = arith.maximumf %26, %27 : vector<1x8xf32>
      %c0_20 = arith.constant 0 : index
      %c0_21 = arith.constant 0 : index
      %29 = vector.load %arg5[%c0_20, %c0_21] : memref<128x8xf32, #tpu.memory_space<vmem>>, vector<128x8xf32>
      %30 = vector.broadcast %28 : vector<1x8xf32> to vector<128x8xf32>
      %31 = arith.mulf %29, %30 : vector<128x8xf32>
      %cst_22 = arith.constant dense<0.000000e+00> : vector<128xf32>
      %32 = vector.multi_reduction <add>, %31, %cst_22 [1] : vector<128x8xf32> to vector<128xf32>
      %33 = vector.shape_cast %32 : vector<128xf32> to vector<128x1xf32>
      %c0_23 = arith.constant 0 : index
      %c0_24 = arith.constant 0 : index
      %34 = vector.load %arg6[%c0_23, %c0_24] : memref<128x1xf32, #tpu.memory_space<vmem>>, vector<128x1xf32>
      %35 = arith.addf %33, %34 : vector<128x1xf32>
      %36 = arith.negf %35 : vector<128x1xf32>
      %37 = math.exp %36 : vector<128x1xf32>
      %cst_25 = arith.constant 1.000000e+00 : f32
      %38 = vector.broadcast %cst_25 : f32 to vector<128x1xf32>
      %39 = arith.addf %38, %37 : vector<128x1xf32>
      %40 = arith.divf %38, %39 : vector<128x1xf32>
      %c0_26 = arith.constant 0 : index
      %c0_27 = arith.constant 0 : index
      %41 = vector.load %arg7[%c0_26, %c0_27] : memref<128x128xbf16, #tpu.memory_space<vmem>>, vector<128x128xbf16>
      %c0_28 = arith.constant 0 : index
      %c0_29 = arith.constant 0 : index
      %c0_30 = arith.constant 0 : index
      %42 = vector.load %arg8[%c0_28, %c0_29, %c0_30] : memref<1x128x1xf32, #tpu.memory_space<vmem>>, vector<1x128x1xf32>
      %43 = vector.shape_cast %42 : vector<1x128x1xf32> to vector<128x1xf32>
      %c0_31 = arith.constant 0 : index
      %c0_32 = arith.constant 0 : index
      %c0_33 = arith.constant 0 : index
      %44 = vector.load %arg10[%c0_31, %c0_32, %c0_33] : memref<1x128x256xf32, #tpu.memory_space<vmem>>, vector<1x128x256xf32>
      %45 = vector.shape_cast %44 : vector<1x128x256xf32> to vector<128x256xf32>
      %46 = vector.broadcast %40 : vector<128x1xf32> to vector<128x256xf32>
      %47 = arith.mulf %45, %46 : vector<128x256xf32>
      %48 = arith.truncf %47 : vector<128x256xf32> to vector<128x256xbf16>
      %cst_34 = arith.constant dense<0.000000e+00> : vector<128x256xf32>
      %49 = tpu.matmul %41, %48, %cst_34 {dimension_numbers = #tpu.dot_dimension_numbers<[1], [0], [0], [1], [0, 0, 1, 1], [], []>} : vector<128x128xbf16>, vector<128x256xbf16>, vector<128x256xf32> -> vector<128x256xf32>
      %50 = vector.broadcast %43 : vector<128x1xf32> to vector<128x256xf32>
      %51 = arith.addf %49, %50 : vector<128x256xf32>
      %52 = arith.negf %51 : vector<128x256xf32>
      %53 = math.exp %52 : vector<128x256xf32>
      %cst_35 = arith.constant 1.000000e+00 : f32
      %54 = vector.broadcast %cst_35 : f32 to vector<128x256xf32>
      %55 = arith.addf %54, %53 : vector<128x256xf32>
      %56 = arith.divf %54, %55 : vector<128x256xf32>
      %cst_36 = arith.constant 1.000000e+00 : f32
      %57 = vector.broadcast %cst_36 : f32 to vector<128x256xf32>
      %58 = arith.addf %57, %56 : vector<128x256xf32>
      %59 = arith.mulf %47, %58 : vector<128x256xf32>
      %c0_37 = arith.constant 0 : index
      %c0_38 = arith.constant 0 : index
      %c0_39 = arith.constant 0 : index
      %60 = vector.load %arg9[%c0_37, %c0_38, %c0_39] : memref<1x128x256xf32, #tpu.memory_space<vmem>>, vector<1x128x256xf32>
      %61 = vector.shape_cast %60 : vector<1x128x256xf32> to vector<128x256xf32>
      %62 = vector.shape_cast %59 : vector<128x256xf32> to vector<1x128x256xf32>
      tpu.vector_store %arg9[%c0_37, %c0_38, %c0_39], %62 {strides = array<i32>} : memref<1x128x256xf32, #tpu.memory_space<vmem>>, vector<1x128x256xf32>,
    } else {
    }
    return
  }
  func.func @transform_0(%arg0: i32, %arg1: i32) -> (i32, i32, i32) {
    %c0_i32 = arith.constant 0 : i32
    %c0_i32_0 = arith.constant 0 : i32
    return %arg0, %c0_i32, %arg1 : i32, i32, i32
  }
  func.func @transform_1(%arg0: i32, %arg1: i32) -> (i32, i32) {
    %c0_i32 = arith.constant 0 : i32
    %c0_i32_0 = arith.constant 0 : i32
    %c0_i32_1 = arith.constant 0 : i32
    return %c0_i32, %c0_i32_0 : i32, i32
  }
  func.func @transform_2(%arg0: i32, %arg1: i32) -> (i32, i32) {
    %c0_i32 = arith.constant 0 : i32
    %c0_i32_0 = arith.constant 0 : i32
    %c0_i32_1 = arith.constant 0 : i32
    return %c0_i32, %c0_i32_0 : i32, i32
  }
  func.func @transform_3(%arg0: i32, %arg1: i32) -> (i32, i32) {
    %c0_i32 = arith.constant 0 : i32
    %c0_i32_0 = arith.constant 0 : i32
    %c0_i32_1 = arith.constant 0 : i32
    return %c0_i32, %c0_i32_0 : i32, i32
  }
  func.func @transform_4(%arg0: i32, %arg1: i32) -> (i32, i32) {
    %c0_i32 = arith.constant 0 : i32
    %c0_i32_0 = arith.constant 0 : i32
    %c0_i32_1 = arith.constant 0 : i32
    return %c0_i32, %c0_i32_0 : i32, i32
  }
  func.func @transform_5(%arg0: i32, %arg1: i32) -> (i32, i32) {
    %c0_i32 = arith.constant 0 : i32
    %c0_i32_0 = arith.constant 0 : i32
    %c0_i32_1 = arith.constant 0 : i32
    return %c0_i32, %c0_i32_0 : i32, i32
  }
  func.func @transform_6(%arg0: i32, %arg1: i32) -> (i32, i32, i32) {
    %c0_i32 = arith.constant 0 : i32
    %c0_i32_0 = arith.constant 0 : i32
    %c0_i32_1 = arith.constant 0 : i32
    return %arg0, %c0_i32, %c0_i32_0 : i32, i32, i32
  }
  func.func @transform_7(%arg0: i32, %arg1: i32) -> (i32, i32, i32) {
    %c0_i32 = arith.constant 0 : i32
    %c0_i32_0 = arith.constant 0 : i32
    %c0_i32_1 = arith.constant 0 : i32
    return %arg0, %c0_i32, %c0_i32_0 : i32, i32, i32
  }
}

</mosaic_0001>

<bundles_post_ra>
// kernel: tpu_custom_call.1
= control target key start
LH: loop header
LB: loop body
LE: loop exit
PB: predicated region body
PF: predicated region fallthrough
CT: control target
= control target key end

     0   :  { %12 = vsyncpa [#allocation5], 0  ;;  %s2918_s0 = inlined_call_operand.vmem [shape: f32[2,128,256], index: 0, kind: input, shape index: {}]   ;;  %s2919_s1 = inlined_call_operand.vmem [shape: f32[128,8], index: 1, kind: input, shape index: {}]   ;;  %s2920_s2 = inlined_call_operand.vmem [shape: f32[1,8], index: 2, kind: input, shape index: {}]   ;;  %s2921_s3 = inlined_call_operand.vmem [shape: f32[128,8], index: 3, kind: input, shape index: {}]   ;;  %s2922_s4 = inlined_call_operand.vmem [shape: f32[128,1], index: 4, kind: input, shape index: {}]   ;;  %s2923_s5 = inlined_call_operand.vmem [shape: bf16[128,128], index: 5, kind: input, shape index: {}]   ;;  %s2924_s6 = inlined_call_operand.vmem [shape: f32[2,128,1], index: 6, kind: input, shape index: {}]   ;;  %s2925_s7 = inlined_call_operand.hbm [shape: f32[2,128,256], index: 7, kind: output, shape index: {}]  }
   0x1   :  { %14 = vsyncpa [#allocation5 + $0x1], 0  ;;  %s2244_s24 = smov 0   ;;  %s2246_s25 = smov 0  }
   0x2   :  { %s2248_s26 = smov 0   ;;  %s2250_s27 = smov 0  }
   0x3   :  { %s2252_s28 = smov 0   ;;  %s2254_s29 = smov 0  }
   0x4 LB: > { %s1736_s30 = sadd.s32 4294967295, %s2197_s29   ;;  %s1737_s8 = sadd.s32 4294967294, %s2197_s29   ;;  %s2197_s29 = sphi %s2254_s29, %s20_s29   ;;  %s2193_s28 = sphi %s2252_s28, %s2953_s28   ;;  %s2189_s27 = sphi %s2250_s27, %s2952_s27   ;;  %s2185_s26 = sphi %s2248_s26, %s2951_s26   ;;  %s2181_s25 = sphi %s2246_s25, %s2950_s25   ;;  %s2177_s24 = sphi %s2244_s24, %s2949_s24  }
   0x5   : > { %s32_s9 = sadd.s32 1, %s2193_s28  ;;  %s198_s10 = sadd.s32 1, %s2185_s26 }
   0x6   : > { %p34_p0 = scmp.ge.s32.totalorder %s32_s9, 2  ;;  %p208_p1 = scmp.ne.s32.totalorder %s2185_s26, %s2181_s25 }
   0x7   : > { %p209_p2 = scmp.eq.s32.totalorder %s1736_s30, 1  ;;  %p214_p3 = scmp.ne.s32.totalorder %s2181_s25, %s2177_s24 }
   0x8   : > { %s2955_s9 = smov (%p34_p0, %s32_s9), 0  ;;  %p215_p5 = scmp.eq.s32.totalorder %s1737_s8, 1 }
   0x9   : > { %p2284_p4 = por %p209_p2, %p208_p1  ;;  %s195_s12 = ssub.s32 %s2193_s28, %s2955_s9 }
   0xa   : > { %p1740_p6 = scmp.ge.s32.totalorder %s2197_s29, 1  ;;  %p196_p7 = scmp.eq.s32.totalorder %s195_s12, 0 }
   0xb   : > { %p2291_p8 = por %p215_p5, %p214_p3  ;;  %p269_p9 = scmp.lt.s32.totalorder %s2197_s29, 3 }
   0xc   : > { %s2297_s14 = scalar_select %p196_p7, %s2185_s26, %s198_s10  }
   0xd   : > { %p270_p10 = pnand %p1740_p6, %p269_p9 }
   0xf   : > { %273 = sbr.rel (%p270_p10) target bundleno = 1041 (0x411), region = 48 }
  0x16   : > { %p311_p11 = scmp.lt.s32.totalorder %s2189_s27, 1  ;;  %vm330_vm0 = vcmask 7168   ;;  %v2199_v0 = vmov 0.0   ;;  %v2200_v49 = vmov 0   ;;  %vm658_vm1 = vcmask 64512   ;;  %s1809_s12 = sshll.u32 %s2189_s27, 12 }
  0x17   : > { %333 = vst.msk [vmem:[#allocation3 + $0x10] sm:$0xff] %vm330_vm0, %v2199_v0  ;;  %331 = vst.msk [vmem:[#allocation3] sm:$0xff] %vm330_vm0, %v2199_v0  ;;  %1886 = vset.pattern.permute.xlu1 %v2200_v49  ;;  %1885 = vset.pattern.permute.xlu0 %v2200_v49 }
  0x18   : > { %332 = vst.msk [vmem:[#allocation3 + $0x8] sm:$0xff] %vm330_vm0, %v2199_v0  ;;  %334 = vst.msk [vmem:[#allocation3 + $0x18] sm:$0xff] %vm330_vm0, %v2199_v0  ;;  %s2319_s15 = scalar_select %p311_p11, %s2189_s27, 1  ;;  %1263 = vmatprep.mubr.bf16.mxu0 %v2200_v49  ;;  %1303 = vmatprep.mubr.bf16.mxu1 %v2200_v49 }
  0x19   : > { %335 = vst.msk [vmem:[#allocation3 + $0x20] sm:$0xff] %vm330_vm0, %v2199_v0  ;;  %336 = vst.msk [vmem:[#allocation3 + $0x28] sm:$0xff] %vm330_vm0, %v2199_v0  ;;  %s2862_s27 = scalar_lea.hbm %s2925_s7, %s1809_s12 }
  0x1a   : > { %337 = vst.msk [vmem:[#allocation3 + $0x30] sm:$0xff] %vm330_vm0, %v2199_v0  ;;  %338 = vst.msk [vmem:[#allocation3 + $0x38] sm:$0xff] %vm330_vm0, %v2199_v0  ;;  %s1807_s16 = sshll.u32 %s2319_s15, 8  ;;  %s1808_s18 = sshll.u32 %s2319_s15, 7 }
  0x1b   : > { %339 = vst.msk [vmem:[#allocation3 + $0x40] sm:$0xff] %vm330_vm0, %v2199_v0  ;;  %340 = vst.msk [vmem:[#allocation3 + $0x48] sm:$0xff] %vm330_vm0, %v2199_v0  ;;  %s2325_s19 = scalar_lea.vmem %s2918_s0, %s1807_s16  ;;  %s2562_s22 = scalar_lea.vmem %s2924_s6, %s1808_s18 }
  0x1c   : > { %341 = vst.msk [vmem:[#allocation3 + $0x50] sm:$0xff] %vm330_vm0, %v2199_v0  ;;  %342 = vst.msk [vmem:[#allocation3 + $0x58] sm:$0xff] %vm330_vm0, %v2199_v0  ;;  %v351_v1 = vld [vmem:[%s2325_s19 + $0x20] sm:$0xff]  ;;  %v352_v2 = vld [vmem:[%s2325_s19 + $0x28] sm:$0xff] }
  0x1d   : > { %343 = vst.msk [vmem:[#allocation3 + $0x60] sm:$0xff] %vm330_vm0, %v2199_v0  ;;  %344 = vst.msk [vmem:[#allocation3 + $0x68] sm:$0xff] %vm330_vm0, %v2199_v0  ;;  %v347_v3 = vld [vmem:[%s2325_s19] sm:$0xff]  ;;  %v436_v4 = vadd.f32 %v352_v2, %v351_v1  ;;  %v348_v5 = vld [vmem:[%s2325_s19 + $0x8] sm:$0xff] }
  0x1e   : > { %345 = vst.msk [vmem:[#allocation3 + $0x70] sm:$0xff] %vm330_vm0, %v2199_v0  ;;  %346 = vst.msk [vmem:[#allocation3 + $0x78] sm:$0xff] %vm330_vm0, %v2199_v0  ;;  %v353_v6 = vld [vmem:[%s2325_s19 + $0x30] sm:$0xff]  ;;  %v354_v7 = vld [vmem:[%s2325_s19 + $0x38] sm:$0xff]  ;;  %v430_v8 = vadd.f32 %v348_v5, %v347_v3 }
  0x1f   : > { %v349_v9 = vld [vmem:[%s2325_s19 + $0x10] sm:$0xff]  ;;  %v350_v10 = vld [vmem:[%s2325_s19 + $0x18] sm:$0xff]  ;;  %437 = vadd.xlane.f32.xlu1 %v436_v4  ;;  %v439_v11 = vadd.f32 %v354_v7, %v353_v6  ;;  %v355_v15 = vld [vmem:[%s2325_s19 + $0x40] sm:$0xff] }
  0x20   : > { %431 = vadd.xlane.f32.xlu0 %v430_v8  ;;  %v433_v12 = vadd.f32 %v350_v10, %v349_v9  ;;  %v357_v13 = vld [vmem:[%s2325_s19 + $0x50] sm:$0xff]  ;;  %v358_v14 = vld [vmem:[%s2325_s19 + $0x58] sm:$0xff]  ;;  %v356_v16 = vld [vmem:[%s2325_s19 + $0x48] sm:$0xff] }
  0x21   : > { %v445_v17 = vadd.f32 %v358_v14, %v357_v13  ;;  %v361_v18 = vld [vmem:[%s2325_s19 + $0x70] sm:$0xff]  ;;  %v362_v19 = vld [vmem:[%s2325_s19 + $0x78] sm:$0xff]  ;;  %v442_v20 = vadd.f32 %v356_v16, %v355_v15  ;;  %v359_v21 = vld [vmem:[%s2325_s19 + $0x60] sm:$0xff] }
  0x22   : > { %v360_v22 = vld [vmem:[%s2325_s19 + $0x68] sm:$0xff]  ;;  %v451_v23 = vadd.f32 %v362_v19, %v361_v18  ;;  %v365_v24 = vld [vmem:[%s2325_s19 + $0x90] sm:$0xff]  ;;  %v366_v25 = vld [vmem:[%s2325_s19 + $0x98] sm:$0xff] }
  0x23   : > { %440 = vadd.xlane.f32.xlu1 %v439_v11  ;;  %v448_v26 = vadd.f32 %v360_v22, %v359_v21  ;;  %v363_v27 = vld [vmem:[%s2325_s19 + $0x80] sm:$0xff]  ;;  %v364_v28 = vld [vmem:[%s2325_s19 + $0x88] sm:$0xff]  ;;  %v457_v29 = vadd.f32 %v366_v25, %v365_v24  ;;  %v369_v30 = vld [vmem:[%s2325_s19 + $0xb0] sm:$0xff] }
  0x24   : > { %434 = vadd.xlane.f32.xlu0 %v433_v12  ;;  %v370_v31 = vld [vmem:[%s2325_s19 + $0xb8] sm:$0xff]  ;;  %v454_v32 = vadd.f32 %v364_v28, %v363_v27  ;;  %v367_v33 = vld [vmem:[%s2325_s19 + $0xa0] sm:$0xff]  ;;  %v368_v34 = vld [vmem:[%s2325_s19 + $0xa8] sm:$0xff] }
  0x25   : > { %v463_v35 = vadd.f32 %v370_v31, %v369_v30  ;;  %v373_v36 = vld [vmem:[%s2325_s19 + $0xd0] sm:$0xff]  ;;  %v374_v37 = vld [vmem:[%s2325_s19 + $0xd8] sm:$0xff]  ;;  %v460_v38 = vadd.f32 %v368_v34, %v367_v33  ;;  %v371_v39 = vld [vmem:[%s2325_s19 + $0xc0] sm:$0xff] }
  0x26   : > { %v372_v40 = vld [vmem:[%s2325_s19 + $0xc8] sm:$0xff]  ;;  %v469_v41 = vadd.f32 %v374_v37, %v373_v36  ;;  %v377_v42 = vld [vmem:[%s2325_s19 + $0xf0] sm:$0xff]  ;;  %v378_v43 = vld [vmem:[%s2325_s19 + $0xf8] sm:$0xff] }
  0x27   : > { %446 = vadd.xlane.f32.xlu1 %v445_v17  ;;  %v466_v44 = vadd.f32 %v372_v40, %v371_v39  ;;  %v375_v45 = vld [vmem:[%s2325_s19 + $0xe0] sm:$0xff]  ;;  %v376_v46 = vld [vmem:[%s2325_s19 + $0xe8] sm:$0xff]  ;;  %v475_v47 = vadd.f32 %v378_v43, %v377_v42  ;;  %v416_v50 = vld [vmem:[#allocation3 + $0x10] sm:$0xff] }
  0x28   : > { %443 = vadd.xlane.f32.xlu0 %v442_v20  ;;  %v472_v48 = vadd.f32 %v376_v46, %v375_v45  ;;  %v414_v51 = vld [vmem:[#allocation3] sm:$0xff]  ;;  %v417_v56 = vld [vmem:[#allocation3 + $0x18] sm:$0xff]  ;;  %v415_v57 = vld [vmem:[#allocation3 + $0x8] sm:$0xff] }
  0x29   : > { %v419_v62 = vld [vmem:[#allocation3 + $0x28] sm:$0xff]  ;;  %v418_v63 = vld [vmem:[#allocation3 + $0x20] sm:$0xff]  ;;  %v421_v3 = vld [vmem:[#allocation3 + $0x38] sm:$0xff] }
  0x2a   : > { %v420_v6 = vld [vmem:[#allocation3 + $0x30] sm:$0xff]  ;;  %v423_v11 = vld [vmem:[#allocation3 + $0x48] sm:$0xff]  ;;  %v422_v15 = vld [vmem:[#allocation3 + $0x40] sm:$0xff] }
  0x2b   : > { %452 = vadd.xlane.f32.xlu1 %v451_v23  ;;  %v425_v20 = vld [vmem:[#allocation3 + $0x58] sm:$0xff]  ;;  %v424_v24 = vld [vmem:[#allocation3 + $0x50] sm:$0xff]  ;;  %v427_v28 = vld [vmem:[#allocation3 + $0x68] sm:$0xff] }
  0x2c   : > { %449 = vadd.xlane.f32.xlu0 %v448_v26  ;;  %v429_v36 = vld [vmem:[#allocation3 + $0x78] sm:$0xff]  ;;  %v428_v42 = vld [vmem:[#allocation3 + $0x70] sm:$0xff] }
  0x2f   : > { %458 = vadd.xlane.f32.xlu1 %v457_v29 }
  0x30   : > { %455 = vadd.xlane.f32.xlu0 %v454_v32  ;;  %v426_v32 = vld [vmem:[#allocation3 + $0x60] sm:$0xff] }
  0x33   : > { %464 = vadd.xlane.f32.xlu1 %v463_v35 }
  0x34   : > { %461 = vadd.xlane.f32.xlu0 %v460_v38 }
  0x37   : > { %470 = vadd.xlane.f32.xlu1 %v469_v41 }
  0x38   : > { %467 = vadd.xlane.f32.xlu0 %v466_v44 }
  0x3b   : > { %476 = vadd.xlane.f32.xlu1 %v475_v47 }
  0x3c   : > { %473 = vadd.xlane.f32.xlu0 %v472_v48 }
  0xac   : > { %v438_v52 = vpop.xlane.xlu1 %437 }
  0xad   : > { %v480_v53 = vadd.f32 %v438_v52, %v416_v50  ;;  %v432_v54 = vpop.xlane.xlu0 %431 }
  0xae   : > { %v478_v55 = vadd.f32 %v432_v54, %v414_v51 }
  0xaf   : > { %497 = vst.msk [vmem:[#allocation3 + $0x10] sm:$0xff] %vm330_vm0, %v480_v53 }
  0xb0   : > { %495 = vst.msk [vmem:[#allocation3] sm:$0xff] %vm330_vm0, %v478_v55  ;;  %v441_v58 = vpop.xlane.xlu1 %440 }
  0xb1   : > { %v481_v59 = vadd.f32 %v441_v58, %v417_v56  ;;  %v435_v60 = vpop.xlane.xlu0 %434 }
  0xb2   : > { %v479_v61 = vadd.f32 %v435_v60, %v415_v57 }
  0xb3   : > { %498 = vst.msk [vmem:[#allocation3 + $0x18] sm:$0xff] %vm330_vm0, %v481_v59 }
  0xb4   : > { %496 = vst.msk [vmem:[#allocation3 + $0x8] sm:$0xff] %vm330_vm0, %v479_v61  ;;  %v447_v0 = vpop.xlane.xlu1 %446 }
  0xb5   : > { %v483_v1 = vadd.f32 %v447_v0, %v419_v62  ;;  %v444_v2 = vpop.xlane.xlu0 %443 }
  0xb6   : > { %v482_v4 = vadd.f32 %v444_v2, %v418_v63  ;;  %v516_v14 = vld [vmem:[#allocation3 + $0x10] sm:$0xff] }
  0xb7   : > { %500 = vst.msk [vmem:[#allocation3 + $0x28] sm:$0xff] %vm330_vm0, %v483_v1  ;;  %v514_v5 = vld [vmem:[#allocation3] sm:$0xff]  ;;  %v532_v21 = vmul.f32 0.00390625, %v516_v14 }
  0xb8   : > { %v453_v7 = vpop.xlane.xlu1 %452  ;;  %v530_v8 = vmul.f32 0.00390625, %v514_v5  ;;  %499 = vst.msk [vmem:[#allocation3 + $0x20] sm:$0xff] %vm330_vm0, %v482_v4  ;;  %v547_v5 = vld [vmem:[%s2919_s1 + $0x8] sm:$0xff] }
  0xb9   : > { %v485_v9 = vadd.f32 %v453_v7, %v421_v3  ;;  %v450_v10 = vpop.xlane.xlu0 %449  ;;  %v546_v7 = vld [vmem:[%s2919_s1] sm:$0xff] }
  0xba   : > { %564 = vperm.xlu0 %1885, %v530_v8   ;;  %v484_v12 = vadd.f32 %v450_v10, %v420_v6  ;;  %v517_v23 = vld [vmem:[#allocation3 + $0x18] sm:$0xff] }
  0xbb   : > { %502 = vst.msk [vmem:[#allocation3 + $0x38] sm:$0xff] %vm330_vm0, %v485_v9  ;;  %v515_v13 = vld [vmem:[#allocation3 + $0x8] sm:$0xff]  ;;  %v533_v29 = vmul.f32 0.00390625, %v517_v23  ;;  %v548_v9 = vld [vmem:[%s2919_s1 + $0x10] sm:$0xff] }
  0xbc   : > { %v459_v16 = vpop.xlane.xlu1 %458  ;;  %v531_v17 = vmul.f32 0.00390625, %v515_v13  ;;  %501 = vst.msk [vmem:[#allocation3 + $0x30] sm:$0xff] %vm330_vm0, %v484_v12 }
  0xbd   : > { %v487_v18 = vadd.f32 %v459_v16, %v423_v11  ;;  %v456_v19 = vpop.xlane.xlu0 %455  ;;  %v549_v11 = vld [vmem:[%s2919_s1 + $0x18] sm:$0xff] }
  0xbe   : > { %569 = vperm.xlu1 %1886, %v531_v17   ;;  %v486_v22 = vadd.f32 %v456_v19, %v422_v15  ;;  %v519_v41 = vld [vmem:[#allocation3 + $0x28] sm:$0xff]  ;;  %v550_v15 = vld [vmem:[%s2919_s1 + $0x20] sm:$0xff] }
  0xbf   : > { %504 = vst.msk [vmem:[#allocation3 + $0x48] sm:$0xff] %vm330_vm0, %v487_v18  ;;  %v518_v31 = vld [vmem:[#allocation3 + $0x20] sm:$0xff]  ;;  %v535_v47 = vmul.f32 0.00390625, %v519_v41  ;;  %v551_v18 = vld [vmem:[%s2919_s1 + $0x28] sm:$0xff] }
  0xc0   : > { %v465_v25 = vpop.xlane.xlu1 %464  ;;  %503 = vst.msk [vmem:[#allocation3 + $0x40] sm:$0xff] %vm330_vm0, %v486_v22  ;;  %v534_v38 = vmul.f32 0.00390625, %v518_v31 }
  0xc1   : > { %v489_v26 = vadd.f32 %v465_v25, %v425_v20  ;;  %v462_v27 = vpop.xlane.xlu0 %461 }
  0xc2   : > { %574 = vperm.xlu1 %1886, %v532_v21   ;;  %v488_v30 = vadd.f32 %v462_v27, %v424_v24  ;;  %v521_v55 = vld [vmem:[#allocation3 + $0x38] sm:$0xff]  ;;  %v552_v24 = vld [vmem:[%s2919_s1 + $0x30] sm:$0xff] }
  0xc3   : > { %506 = vst.msk [vmem:[#allocation3 + $0x58] sm:$0xff] %vm330_vm0, %v489_v26  ;;  %v520_v51 = vld [vmem:[#allocation3 + $0x30] sm:$0xff]  ;;  %v537_v57 = vmul.f32 0.00390625, %v521_v55 }
  0xc4   : > { %v471_v33 = vpop.xlane.xlu1 %470  ;;  %505 = vst.msk [vmem:[#allocation3 + $0x50] sm:$0xff] %vm330_vm0, %v488_v30  ;;  %v536_v53 = vmul.f32 0.00390625, %v520_v51  ;;  %v556_v51 = vld [vmem:[%s2919_s1 + $0x50] sm:$0xff] }
  0xc5   : > { %v491_v34 = vadd.f32 %v471_v33, %v427_v28  ;;  %v468_v35 = vpop.xlane.xlu0 %467  ;;  %v553_v33 = vld [vmem:[%s2919_s1 + $0x38] sm:$0xff] }
  0xc6   : > { %579 = vperm.xlu1 %1886, %v533_v29   ;;  %v523_v37 = vld [vmem:[#allocation3 + $0x48] sm:$0xff]  ;;  %v490_v39 = vadd.f32 %v468_v35, %v426_v32 }
  0xc7   : > { %508 = vst.msk [vmem:[#allocation3 + $0x68] sm:$0xff] %vm330_vm0, %v491_v34  ;;  %v539_v40 = vmul.f32 0.00390625, %v523_v37  ;;  %v522_v59 = vld [vmem:[#allocation3 + $0x40] sm:$0xff] }
  0xc8   : > { %v477_v43 = vpop.xlane.xlu1 %476  ;;  %507 = vst.msk [vmem:[#allocation3 + $0x60] sm:$0xff] %vm330_vm0, %v490_v39  ;;  %v538_v60 = vmul.f32 0.00390625, %v522_v59  ;;  %v555_v39 = vld [vmem:[%s2919_s1 + $0x48] sm:$0xff] }
  0xc9   : > { %v493_v44 = vadd.f32 %v477_v43, %v429_v36  ;;  %609 = vperm.xlu0 %1885, %v539_v40   ;;  %v474_v45 = vpop.xlane.xlu0 %473  ;;  %v559_v59 = vld [vmem:[%s2919_s1 + $0x68] sm:$0xff] }
  0xca   : > { %584 = vperm.xlu1 %1886, %v534_v38   ;;  %v525_v46 = vld [vmem:[#allocation3 + $0x58] sm:$0xff]  ;;  %v492_v48 = vadd.f32 %v474_v45, %v428_v42  ;;  %v554_v42 = vld [vmem:[%s2919_s1 + $0x40] sm:$0xff] }
  0xcb   : > { %510 = vst.msk [vmem:[#allocation3 + $0x78] sm:$0xff] %vm330_vm0, %v493_v44  ;;  %v541_v50 = vmul.f32 0.00390625, %v525_v46  ;;  %v524_v61 = vld [vmem:[#allocation3 + $0x50] sm:$0xff] }
  0xcc   : > { %509 = vst.msk [vmem:[#allocation3 + $0x70] sm:$0xff] %vm330_vm0, %v492_v48  ;;  %v540_v62 = vmul.f32 0.00390625, %v524_v61  ;;  %v557_v48 = vld [vmem:[%s2919_s1 + $0x58] sm:$0xff]  ;;  %v558_v61 = vld [vmem:[%s2919_s1 + $0x60] sm:$0xff] }
  0xcd   : > { %619 = vperm.xlu0 %1885, %v541_v50  }
  0xce   : > { %589 = vperm.xlu1 %1886, %v535_v47   ;;  %v527_v52 = vld [vmem:[#allocation3 + $0x68] sm:$0xff] }
  0xcf   : > { %v543_v54 = vmul.f32 0.00390625, %v527_v52  ;;  %v526_v63 = vld [vmem:[#allocation3 + $0x60] sm:$0xff] }
  0xd0   : > { %v542_v0 = vmul.f32 0.00390625, %v526_v63 }
  0xd1   : > { %629 = vperm.xlu0 %1885, %v543_v54  }
  0xd2   : > { %594 = vperm.xlu1 %1886, %v536_v53   ;;  %v529_v56 = vld [vmem:[#allocation3 + $0x78] sm:$0xff] }
  0xd3   : > { %v545_v58 = vmul.f32 0.00390625, %v529_v56  ;;  %v528_v1 = vld [vmem:[#allocation3 + $0x70] sm:$0xff] }
  0xd4   : > { %v544_v2 = vmul.f32 0.00390625, %v528_v1 }
  0xd5   : > { %639 = vperm.xlu0 %1885, %v545_v58  }
  0xd6   : > { %599 = vperm.xlu1 %1886, %v537_v57  }
  0xda   : > { %604 = vperm.xlu1 %1886, %v538_v60  }
  0xde   : > { %614 = vperm.xlu1 %1886, %v540_v62  }
  0xe2   : > { %624 = vperm.xlu1 %1886, %v542_v0  }
  0xe6   : > { %634 = vperm.xlu1 %1886, %v544_v2  }
 0x139   : > { %v565_v8 = vpop.permute.xlu0 %564 }
 0x13a   : > { %v642_v13 = vmul.f32 %v565_v8, %v546_v7  ;;  %v560_v7 = vld [vmem:[%s2919_s1 + $0x70] sm:$0xff] }
 0x13c   : > { %v659_v20 = vsel %vm658_vm1, %v642_v13, 0.0 }
 0x13d   : > { %v570_v3 = vpop.permute.xlu1 %569 }
 0x13e   : > { %v643_v10 = vmul.f32 %v570_v3, %v547_v5 }
 0x140   : > { %v660_v16 = vsel %vm658_vm1, %v643_v10, 0.0 }
 0x141   : > { %v575_v4 = vpop.permute.xlu1 %574  ;;  %v661_v23 = vadd.f32 %v660_v16, %v659_v20 }
 0x142   : > { %v644_v14 = vmul.f32 %v575_v4, %v548_v9  ;;  %v561_v4 = vld [vmem:[%s2919_s1 + $0x78] sm:$0xff] }
 0x144   : > { %v662_v21 = vsel %vm658_vm1, %v644_v14, 0.0 }
 0x145   : > { %v580_v6 = vpop.permute.xlu1 %579  ;;  %v663_v27 = vadd.f32 %v662_v21, %v661_v23  ;;  %v715_v21 = vlaneseq }
 0x146   : > { %v645_v17 = vmul.f32 %v580_v6, %v549_v11 }
 0x148   : > { %v664_v25 = vsel %vm658_vm1, %v645_v17, 0.0  ;;  %v610_v28 = vpop.permute.xlu0 %609 }
 0x149   : > { %v585_v12 = vpop.permute.xlu1 %584  ;;  %v665_v32 = vadd.f32 %v664_v25, %v663_v27  ;;  %v651_v46 = vmul.f32 %v610_v28, %v555_v39 }
 0x14a   : > { %v646_v22 = vmul.f32 %v585_v12, %v550_v15 }
 0x14b   : > { %v676_v56 = vsel %vm658_vm1, %v651_v46, 0.0 }
 0x14c   : > { %v666_v30 = vsel %vm658_vm1, %v646_v22, 0.0  ;;  %v620_v41 = vpop.permute.xlu0 %619 }
 0x14d   : > { %v590_v19 = vpop.permute.xlu1 %589  ;;  %v667_v35 = vadd.f32 %v666_v30, %v665_v32  ;;  %v653_v57 = vmul.f32 %v620_v41, %v557_v48  ;;  %v699_v32 = vld [vmem:[%s2921_s3] sm:$0xff]  ;;  %v705_v48 = vld [vmem:[%s2921_s3 + $0x30] sm:$0xff] }
 0x14e   : > { %v647_v26 = vmul.f32 %v590_v19, %v551_v18 }
 0x14f   : > { %v680_v1 = vsel %vm658_vm1, %v653_v57, 0.0 }
 0x150   : > { %v668_v34 = vsel %vm658_vm1, %v647_v26, 0.0  ;;  %v630_v53 = vpop.permute.xlu0 %629  ;;  %v696_v26 = vld [vmem:[%s2920_s2] sm:$0x1] }
 0x151   : > { %v595_v29 = vpop.permute.xlu1 %594  ;;  %v669_v40 = vadd.f32 %v668_v34, %v667_v35  ;;  %v655_v2 = vmul.f32 %v630_v53, %v559_v59  ;;  %v701_v34 = vld [vmem:[%s2921_s3 + $0x10] sm:$0xff]  ;;  %v702_v35 = vld [vmem:[%s2921_s3 + $0x18] sm:$0xff] }
 0x152   : > { %v648_v31 = vmul.f32 %v595_v29, %v552_v24  ;;  %v716_v24 = vshrl.u32 %v715_v21, 7 }
 0x153   : > { %v684_v11 = vsel %vm658_vm1, %v655_v2, 0.0 }
 0x154   : > { %v670_v37 = vsel %vm658_vm1, %v648_v31, 0.0  ;;  %v640_v5 = vpop.permute.xlu0 %639  ;;  %v717_v28 = vsub.s32 0, %v716_v24  ;;  %v700_v31 = vld [vmem:[%s2921_s3 + $0x8] sm:$0xff]  ;;  %v786_v24 = vld [vmem:[%s2922_s4 + $0x18] sm:$0xff] }
 0x155   : > { %v600_v36 = vpop.permute.xlu1 %599  ;;  %v671_v44 = vadd.f32 %v670_v37, %v669_v40  ;;  %v657_v12 = vmul.f32 %v640_v5, %v561_v4  ;;  %v712_v4 = vld [vmem:[%s2921_s3 + $0x68] sm:$0xff] }
 0x156   : > { %v649_v38 = vmul.f32 %v600_v36, %v553_v33 }
 0x157   : > { %v688_v17 = vsel %vm658_vm1, %v657_v12, 0.0 }
 0x158   : > { %v672_v43 = vsel %vm658_vm1, %v649_v38, 0.0 }
 0x159   : > { %v605_v45 = vpop.permute.xlu1 %604  ;;  %v673_v50 = vadd.f32 %v672_v43, %v671_v44  ;;  %v704_v43 = vld [vmem:[%s2921_s3 + $0x28] sm:$0xff] }
 0x15a   : > { %v650_v47 = vmul.f32 %v605_v45, %v554_v42  ;;  %v703_v42 = vld [vmem:[%s2921_s3 + $0x20] sm:$0xff] }
 0x15c   : > { %v674_v52 = vsel %vm658_vm1, %v650_v47, 0.0 }
 0x15d   : > { %v675_v54 = vadd.f32 %v674_v52, %v673_v50  ;;  %v615_v55 = vpop.permute.xlu1 %614  ;;  %v706_v50 = vld [vmem:[%s2921_s3 + $0x38] sm:$0xff] }
 0x15e   : > { %v652_v58 = vmul.f32 %v615_v55, %v556_v51  ;;  %v707_v55 = vld [vmem:[%s2921_s3 + $0x40] sm:$0xff] }
 0x15f   : > { %v677_v60 = vadd.f32 %v676_v56, %v675_v54  ;;  %v708_v56 = vld [vmem:[%s2921_s3 + $0x48] sm:$0xff] }
 0x160   : > { %v678_v62 = vsel %vm658_vm1, %v652_v58, 0.0 }
 0x161   : > { %v679_v63 = vadd.f32 %v678_v62, %v677_v60  ;;  %v625_v0 = vpop.permute.xlu1 %624  ;;  %v710_v62 = vld [vmem:[%s2921_s3 + $0x58] sm:$0xff] }
 0x162   : > { %v654_v3 = vmul.f32 %v625_v0, %v558_v61  ;;  %v709_v61 = vld [vmem:[%s2921_s3 + $0x50] sm:$0xff] }
 0x163   : > { %v681_v6 = vadd.f32 %v680_v1, %v679_v63 }
 0x164   : > { %v682_v8 = vsel %vm658_vm1, %v654_v3, 0.0  ;;  %v711_v3 = vld [vmem:[%s2921_s3 + $0x60] sm:$0xff] }
 0x165   : > { %v683_v9 = vadd.f32 %v682_v8, %v681_v6  ;;  %v635_v10 = vpop.permute.xlu1 %634 }
 0x166   : > { %v656_v13 = vmul.f32 %v635_v10, %v560_v7  ;;  %v714_v10 = vld [vmem:[%s2921_s3 + $0x78] sm:$0xff] }
 0x167   : > { %v685_v14 = vadd.f32 %v684_v11, %v683_v9  ;;  %v713_v9 = vld [vmem:[%s2921_s3 + $0x70] sm:$0xff] }
 0x168   : > { %v686_v15 = vsel %vm658_vm1, %v656_v13, 0.0 }
 0x169   : > { %v687_v16 = vadd.f32 %v686_v15, %v685_v14 }
 0x16b   : > { %v689_v18 = vadd.f32 %v688_v17, %v687_v16  ;;  %v784_v17 = vld [vmem:[%s2922_s4 + $0x8] sm:$0xff] }
 0x16d   : > { %v690_v19 = vrot.slane %v689_v18, 4 }
 0x16f   : > { %v691_v20 = vadd.f32 %v690_v19, %v689_v18  ;;  %v783_v18 = vld [vmem:[%s2922_s4] sm:$0xff] }
 0x171   : > { %v692_v22 = vrot.slane %v691_v20, 2 }
 0x173   : > { %v693_v23 = vadd.f32 %v692_v22, %v691_v20 }
 0x175   : > { %v694_v25 = vrot.slane %v693_v23, 1 }
 0x177   : > { %v695_v27 = vadd.f32 %v694_v25, %v693_v23  ;;  %v785_v23 = vld [vmem:[%s2922_s4 + $0x10] sm:$0xff] }
 0x179   : > { %v697_v29 = vadd.f32 %v696_v26, %v695_v27 }
 0x17b   : > { %v698_v30 = vmax.f32 %v697_v29, 0.0 }
 0x17d   : > { %v718_v33 = vrot.slane %v698_v30, %v717_v28 }
 0x17f   : > { %v720_v36 = vmul.f32 %v718_v33, %v700_v31  ;;  %v719_v37 = vmul.f32 %v718_v33, %v699_v32  ;;  %v721_v40 = vmul.f32 %v718_v33, %v701_v34  ;;  %v722_v41 = vmul.f32 %v718_v33, %v702_v35  ;;  %v787_v31 = vld [vmem:[%s2922_s4 + $0x20] sm:$0xff]  ;;  %v788_v32 = vld [vmem:[%s2922_s4 + $0x28] sm:$0xff] }
 0x180   : > { %v723_v46 = vmul.f32 %v718_v33, %v703_v42  ;;  %v724_v47 = vmul.f32 %v718_v33, %v704_v43  ;;  %v725_v53 = vmul.f32 %v718_v33, %v705_v48  ;;  %v726_v54 = vmul.f32 %v718_v33, %v706_v50  ;;  %v792_v48 = vld [vmem:[%s2922_s4 + $0x48] sm:$0xff] }
 0x181   : > { %v738_v38 = vsel %vm658_vm1, %v720_v36, 0.0  ;;  %v735_v39 = vsel %vm658_vm1, %v719_v37, 0.0  ;;  %v741_v44 = vsel %vm658_vm1, %v721_v40, 0.0  ;;  %v744_v45 = vsel %vm658_vm1, %v722_v41, 0.0  ;;  %v790_v40 = vld [vmem:[%s2922_s4 + $0x38] sm:$0xff] }
 0x182   : > { %739 = vadd.xlane.f32.xlu0 %v738_v38  ;;  %736 = vadd.xlane.f32.xlu1 %v735_v39  ;;  %v747_v51 = vsel %vm658_vm1, %v723_v46, 0.0  ;;  %v750_v52 = vsel %vm658_vm1, %v724_v47, 0.0  ;;  %v753_v57 = vsel %vm658_vm1, %v725_v53, 0.0  ;;  %v756_v58 = vsel %vm658_vm1, %v726_v54, 0.0  ;;  %v789_v39 = vld [vmem:[%s2922_s4 + $0x30] sm:$0xff]  ;;  %v791_v47 = vld [vmem:[%s2922_s4 + $0x40] sm:$0xff] }
 0x183   : > { %v727_v59 = vmul.f32 %v718_v33, %v707_v55  ;;  %v728_v60 = vmul.f32 %v718_v33, %v708_v56  ;;  %v729_v1 = vmul.f32 %v718_v33, %v709_v61  ;;  %v730_v2 = vmul.f32 %v718_v33, %v710_v62  ;;  %v794_v61 = vld [vmem:[%s2922_s4 + $0x58] sm:$0xff] }
 0x184   : > { %v731_v7 = vmul.f32 %v718_v33, %v711_v3  ;;  %v732_v8 = vmul.f32 %v718_v33, %v712_v4  ;;  %v733_v13 = vmul.f32 %v718_v33, %v713_v9  ;;  %v734_v14 = vmul.f32 %v718_v33, %v714_v10  ;;  %v796_v9 = vld [vmem:[%s2922_s4 + $0x68] sm:$0xff] }
 0x185   : > { %v759_v63 = vsel %vm658_vm1, %v727_v59, 0.0  ;;  %v762_v0 = vsel %vm658_vm1, %v728_v60, 0.0  ;;  %v765_v5 = vsel %vm658_vm1, %v729_v1, 0.0  ;;  %v768_v6 = vsel %vm658_vm1, %v730_v2, 0.0  ;;  %v793_v60 = vld [vmem:[%s2922_s4 + $0x50] sm:$0xff] }
 0x186   : > { %742 = vadd.xlane.f32.xlu0 %v741_v44  ;;  %745 = vadd.xlane.f32.xlu1 %v744_v45  ;;  %v771_v11 = vsel %vm658_vm1, %v731_v7, 0.0  ;;  %v774_v12 = vsel %vm658_vm1, %v732_v8, 0.0  ;;  %v777_v15 = vsel %vm658_vm1, %v733_v13, 0.0  ;;  %v780_v16 = vsel %vm658_vm1, %v734_v14, 0.0  ;;  %v795_v8 = vld [vmem:[%s2922_s4 + $0x60] sm:$0xff] }
 0x18a   : > { %748 = vadd.xlane.f32.xlu0 %v747_v51  ;;  %751 = vadd.xlane.f32.xlu1 %v750_v52 }
 0x18e   : > { %754 = vadd.xlane.f32.xlu0 %v753_v57  ;;  %757 = vadd.xlane.f32.xlu1 %v756_v58 }
 0x192   : > { %760 = vadd.xlane.f32.xlu0 %v759_v63  ;;  %763 = vadd.xlane.f32.xlu1 %v762_v0 }
 0x196   : > { %766 = vadd.xlane.f32.xlu0 %v765_v5  ;;  %769 = vadd.xlane.f32.xlu1 %v768_v6 }
 0x19a   : > { %772 = vadd.xlane.f32.xlu0 %v771_v11  ;;  %775 = vadd.xlane.f32.xlu1 %v774_v12 }
 0x19e   : > { %778 = vadd.xlane.f32.xlu0 %v777_v15  ;;  %781 = vadd.xlane.f32.xlu1 %v780_v16 }
 0x20f   : > { %v740_v19 = vpop.xlane.xlu0 %739  ;;  %v737_v20 = vpop.xlane.xlu1 %736 }
 0x210   : > { %v800_v21 = vadd.f32 %v784_v17, %v740_v19  ;;  %v799_v22 = vadd.f32 %v783_v18, %v737_v20  ;;  %v797_v20 = vld [vmem:[%s2922_s4 + $0x70] sm:$0xff] }
 0x212   : > { %v1747_v25 = vmul.f32 -1.442695, %v800_v21  ;;  %v1746_v26 = vmul.f32 -1.442695, %v799_v22  ;;  %v798_v21 = vld [vmem:[%s2922_s4 + $0x78] sm:$0xff] }
 0x213   : > { %v743_v27 = vpop.xlane.xlu0 %742  ;;  %v746_v28 = vpop.xlane.xlu1 %745 }
 0x214   : > { %1895 = vpow2.f32 %v1747_v25  ;;  %v801_v29 = vadd.f32 %v785_v23, %v743_v27  ;;  %v802_v30 = vadd.f32 %v786_v24, %v746_v28 }
 0x215   : > { %1897 = vpow2.f32 %v1746_v26 }
 0x216   : > { %v1748_v33 = vmul.f32 -1.442695, %v801_v29  ;;  %v1749_v34 = vmul.f32 -1.442695, %v802_v30 }
 0x217   : > { %v749_v35 = vpop.xlane.xlu0 %748  ;;  %v752_v36 = vpop.xlane.xlu1 %751 }
 0x218   : > { %1899 = vpow2.f32 %v1748_v33  ;;  %v803_v37 = vadd.f32 %v787_v31, %v749_v35  ;;  %v804_v38 = vadd.f32 %v788_v32, %v752_v36 }
 0x219   : > { %1901 = vpow2.f32 %v1749_v34 }
 0x21a   : > { %v1750_v41 = vmul.f32 -1.442695, %v803_v37  ;;  %v1751_v42 = vmul.f32 -1.442695, %v804_v38 }
 0x21b   : > { %v755_v43 = vpop.xlane.xlu0 %754  ;;  %v758_v44 = vpop.xlane.xlu1 %757 }
 0x21c   : > { %1903 = vpow2.f32 %v1750_v41  ;;  %v805_v45 = vadd.f32 %v789_v39, %v755_v43  ;;  %v806_v46 = vadd.f32 %v790_v40, %v758_v44 }
 0x21d   : > { %1905 = vpow2.f32 %v1751_v42 }
 0x21e   : > { %v1896_v50 = vpop.eup %1895  ;;  %v1752_v51 = vmul.f32 -1.442695, %v805_v45  ;;  %v1753_v54 = vmul.f32 -1.442695, %v806_v46 }
 0x21f   : > { %v1898_v52 = vpop.eup %1897  ;;  %v864_v53 = vadd.f32 1.0, %v1896_v50  ;;  %v761_v55 = vpop.xlane.xlu0 %760 }
 0x220   : > { %v764_v56 = vpop.xlane.xlu1 %763  ;;  %v863_v57 = vadd.f32 1.0, %v1898_v52  ;;  %1907 = vpow2.f32 %v1752_v51  ;;  %v807_v58 = vadd.f32 %v791_v47, %v761_v55 }
 0x221   : > { %v808_v59 = vadd.f32 %v792_v48, %v764_v56  ;;  %1909 = vrcp.f32 %v864_v53 }
 0x222   : > { %v1900_v62 = vpop.eup %1899  ;;  %1911 = vrcp.f32 %v863_v57  ;;  %v1754_v63 = vmul.f32 -1.442695, %v807_v58 }
 0x223   : > { %v1902_v0 = vpop.eup %1901  ;;  %v865_v1 = vadd.f32 1.0, %v1900_v62  ;;  %1913 = vpow2.f32 %v1753_v54  ;;  %v1755_v2 = vmul.f32 -1.442695, %v808_v59  ;;  %v767_v3 = vpop.xlane.xlu0 %766 }
 0x224   : > { %v770_v4 = vpop.xlane.xlu1 %769  ;;  %v866_v5 = vadd.f32 1.0, %v1902_v0  ;;  %1915 = vpow2.f32 %v1754_v63  ;;  %v809_v6 = vadd.f32 %v793_v60, %v767_v3  ;;  %v927_v3 = vld [vmem:[%s2562_s22] sm:$0xff] }
 0x225   : > { %v810_v7 = vadd.f32 %v794_v61, %v770_v4  ;;  %1917 = vrcp.f32 %v865_v1  ;;  %v928_v4 = vld [vmem:[%s2562_s22 + $0x8] sm:$0xff] }
 0x226   : > { %v1904_v10 = vpop.eup %1903  ;;  %1919 = vrcp.f32 %v866_v5  ;;  %v1756_v11 = vmul.f32 -1.442695, %v809_v6  ;;  %v929_v5 = vld [vmem:[%s2562_s22 + $0x10] sm:$0xff]  ;;  %v930_v6 = vld [vmem:[%s2562_s22 + $0x18] sm:$0xff] }
 0x227   : > { %v1906_v12 = vpop.eup %1905  ;;  %v867_v13 = vadd.f32 1.0, %v1904_v10  ;;  %1921 = vpow2.f32 %v1755_v2  ;;  %v1757_v14 = vmul.f32 -1.442695, %v810_v7  ;;  %v773_v15 = vpop.xlane.xlu0 %772  ;;  %v931_v7 = vld [vmem:[%s2562_s22 + $0x20] sm:$0xff]  ;;  %v934_v10 = vld [vmem:[%s2562_s22 + $0x38] sm:$0xff] }
 0x228   : > { %v776_v16 = vpop.xlane.xlu1 %775  ;;  %v868_v17 = vadd.f32 1.0, %v1906_v12  ;;  %1923 = vpow2.f32 %v1756_v11  ;;  %v811_v18 = vadd.f32 %v795_v8, %v773_v15  ;;  %v932_v8 = vld [vmem:[%s2562_s22 + $0x28] sm:$0xff]  ;;  %v935_v11 = vld [vmem:[%s2562_s22 + $0x40] sm:$0xff] }
 0x229   : > { %v812_v19 = vadd.f32 %v796_v9, %v776_v16  ;;  %1925 = vrcp.f32 %v867_v13  ;;  %v933_v9 = vld [vmem:[%s2562_s22 + $0x30] sm:$0xff]  ;;  %v936_v12 = vld [vmem:[%s2562_s22 + $0x48] sm:$0xff]  ;;  %v939_v15 = vld [vmem:[%s2562_s22 + $0x60] sm:$0xff] }
 0x22a   : > { %v1908_v22 = vpop.eup %1907  ;;  %1927 = vrcp.f32 %v868_v17  ;;  %v1758_v23 = vmul.f32 -1.442695, %v811_v18  ;;  %v937_v13 = vld [vmem:[%s2562_s22 + $0x50] sm:$0xff]  ;;  %v940_v16 = vld [vmem:[%s2562_s22 + $0x68] sm:$0xff]  ;;  %v942_v18 = vld [vmem:[%s2562_s22 + $0x78] sm:$0xff] }
 0x22b   : > { %v1759_v24 = vmul.f32 -1.442695, %v812_v19  ;;  %v1910_v25 = vpop.eup %1909  ;;  %v869_v26 = vadd.f32 1.0, %v1908_v22  ;;  %1929 = vpow2.f32 %v1757_v14  ;;  %v779_v27 = vpop.xlane.xlu0 %778  ;;  %v938_v14 = vld [vmem:[%s2562_s22 + $0x58] sm:$0xff]  ;;  %v941_v17 = vld [vmem:[%s2562_s22 + $0x70] sm:$0xff]  ;;  %s2201_s22 = smov [#allocation4]  }
 0x22c   : > { %v782_v28 = vpop.xlane.xlu1 %781  ;;  %v1912_v29 = vpop.eup %1911  ;;  %1931 = vpow2.f32 %v1758_v23  ;;  %v813_v30 = vadd.f32 %v797_v20, %v779_v27  ;;  %982 = vperm.xlu1 %1886, %v1910_v25   ;;  %v2088_v23 = vld [vmem:[%s2325_s19 + $0x18] sm:$0xff]  ;;  %v2089_v25 = vld [vmem:[%s2325_s19] sm:$0xff]  ;;  %v2090_v27 = vld [vmem:[%s2325_s19 + $0x8] sm:$0xff]  ;;  %s2123_s15 = sshll.u32 %s2201_s22, 4  ;;  %s2124_s15 = int_to_ptr.vmem [resolvable:$false] %s2123_s15 }
 0x22d   : > { %v814_v31 = vadd.f32 %v798_v21, %v782_v28  ;;  %v1914_v32 = vpop.eup %1913  ;;  %1933 = vrcp.f32 %v869_v26  ;;  %977 = vperm.xlu0 %1885, %v1912_v29   ;;  %v2087_v21 = vld [vmem:[%s2325_s19 + $0x10] sm:$0xff]  ;;  %s2125_s23 = scalar_lea.vmem %s2124_s15, 8192 }
 0x22e   : > { %v1916_v33 = vpop.eup %1915  ;;  %v870_v34 = vadd.f32 1.0, %v1914_v32  ;;  %1935 = vpow2.f32 %v1759_v24  ;;  %v1760_v35 = vmul.f32 -1.442695, %v813_v30 }
 0x22f   : > { %v1918_v36 = vpop.eup %1917  ;;  %v871_v37 = vadd.f32 1.0, %v1916_v33  ;;  %v1761_v38 = vmul.f32 -1.442695, %v814_v31  ;;  %v2091_v33 = vld [vmem:[%s2325_s19 + $0x20] sm:$0xff] }
 0x230   : > { %v1920_v39 = vpop.eup %1919  ;;  %1937 = vrcp.f32 %v870_v34  ;;  %987 = vperm.xlu1 %1886, %v1918_v36  }
 0x231   : > { %v1922_v40 = vpop.eup %1921  ;;  %1939 = vrcp.f32 %v871_v37  ;;  %992 = vperm.xlu0 %1885, %v1920_v39   ;;  %v2093_v37 = vld [vmem:[%s2325_s19 + $0x30] sm:$0xff]  ;;  %v2094_v39 = vld [vmem:[%s2325_s19 + $0x38] sm:$0xff] }
 0x232   : > { %v1924_v41 = vpop.eup %1923  ;;  %v872_v42 = vadd.f32 1.0, %v1922_v40  ;;  %1941 = vpow2.f32 %v1760_v35  ;;  %v2092_v35 = vld [vmem:[%s2325_s19 + $0x28] sm:$0xff] }
 0x233   : > { %v1926_v43 = vpop.eup %1925  ;;  %v873_v44 = vadd.f32 1.0, %v1924_v41  ;;  %1943 = vpow2.f32 %v1761_v38 }
 0x234   : > { %v1928_v45 = vpop.eup %1927  ;;  %1945 = vrcp.f32 %v872_v42  ;;  %997 = vperm.xlu1 %1886, %v1926_v43  }
 0x235   : > { %v1930_v46 = vpop.eup %1929  ;;  %1947 = vrcp.f32 %v873_v44  ;;  %1002 = vperm.xlu0 %1885, %v1928_v45   ;;  %v2095_v45 = vld [vmem:[%s2325_s19 + $0x40] sm:$0xff] }
 0x236   : > { %v1932_v47 = vpop.eup %1931  ;;  %v874_v48 = vadd.f32 1.0, %v1930_v46 }
 0x237   : > { %v1934_v50 = vpop.eup %1933  ;;  %v875_v51 = vadd.f32 1.0, %v1932_v47  ;;  %v2096_v47 = vld [vmem:[%s2325_s19 + $0x48] sm:$0xff] }
 0x238   : > { %v1936_v52 = vpop.eup %1935  ;;  %1949 = vrcp.f32 %v874_v48  ;;  %1007 = vperm.xlu1 %1886, %v1934_v50   ;;  %v2097_v50 = vld [vmem:[%s2325_s19 + $0x50] sm:$0xff] }
 0x239   : > { %1951 = vrcp.f32 %v875_v51  ;;  %v876_v53 = vadd.f32 1.0, %v1936_v52  ;;  %v2098_v52 = vld [vmem:[%s2325_s19 + $0x58] sm:$0xff] }
 0x23a   : > { %v1938_v54 = vpop.eup %1937 }
 0x23b   : > { %v1940_v55 = vpop.eup %1939  ;;  %1953 = vrcp.f32 %v876_v53  ;;  %1012 = vperm.xlu0 %1885, %v1938_v54  }
 0x23c   : > { %v1942_v56 = vpop.eup %1941  ;;  %1017 = vperm.xlu1 %1886, %v1940_v55  }
 0x23d   : > { %v1944_v57 = vpop.eup %1943  ;;  %v877_v58 = vadd.f32 1.0, %v1942_v56 }
 0x23e   : > { %v1946_v59 = vpop.eup %1945  ;;  %v878_v60 = vadd.f32 1.0, %v1944_v57  ;;  %v2099_v57 = vld [vmem:[%s2325_s19 + $0x60] sm:$0xff] }
 0x23f   : > { %v1948_v61 = vpop.eup %1947  ;;  %1955 = vrcp.f32 %v877_v58  ;;  %1022 = vperm.xlu0 %1885, %v1946_v59   ;;  %v2100_v59 = vld [vmem:[%s2325_s19 + $0x68] sm:$0xff] }
 0x240   : > { %1957 = vrcp.f32 %v878_v60  ;;  %1027 = vperm.xlu1 %1886, %v1948_v61  }
 0x242   : > { %v1950_v62 = vpop.eup %1949 }
 0x243   : > { %v1952_v63 = vpop.eup %1951  ;;  %1032 = vperm.xlu0 %1885, %v1950_v62   ;;  %v2101_v62 = vld [vmem:[%s2325_s19 + $0x70] sm:$0xff] }
 0x244   : > { %1037 = vperm.xlu1 %1886, %v1952_v63  }
 0x245   : > { %v1954_v0 = vpop.eup %1953 }
 0x247   : > { %1042 = vperm.xlu0 %1885, %v1954_v0   ;;  %v2102_v0 = vld [vmem:[%s2325_s19 + $0x78] sm:$0xff] }
 0x249   : > { %v1956_v1 = vpop.eup %1955 }
 0x24a   : > { %v1958_v2 = vpop.eup %1957  ;;  %1047 = vperm.xlu1 %1886, %v1956_v1  }
 0x24b   : > { %1052 = vperm.xlu0 %1885, %v1958_v2  }
 0x24e   : > { %1105 = vperm.xlu1 %1886, %v927_v3  }
 0x24f   : > { %1110 = vperm.xlu0 %1885, %v928_v4  }
 0x252   : > { %1115 = vperm.xlu1 %1886, %v929_v5   ;;  %v2103_v5 = vld [vmem:[%s2325_s19 + $0x80] sm:$0xff] }
 0x253   : > { %1120 = vperm.xlu0 %1885, %v930_v6  }
 0x256   : > { %1125 = vperm.xlu1 %1886, %v931_v7   ;;  %v2104_v7 = vld [vmem:[%s2325_s19 + $0x88] sm:$0xff] }
 0x257   : > { %1130 = vperm.xlu0 %1885, %v932_v8  }
 0x25a   : > { %1135 = vperm.xlu1 %1886, %v933_v9  }
 0x25b   : > { %1140 = vperm.xlu0 %1885, %v934_v10   ;;  %v2105_v10 = vld [vmem:[%s2325_s19 + $0x90] sm:$0xff] }
 0x25e   : > { %1145 = vperm.xlu1 %1886, %v935_v11  }
 0x25f   : > { %1150 = vperm.xlu0 %1885, %v936_v12   ;;  %v2106_v12 = vld [vmem:[%s2325_s19 + $0x98] sm:$0xff] }
 0x262   : > { %1155 = vperm.xlu1 %1886, %v937_v13  }
 0x263   : > { %1160 = vperm.xlu0 %1885, %v938_v14  }
 0x266   : > { %1165 = vperm.xlu1 %1886, %v939_v15  }
 0x267   : > { %1170 = vperm.xlu0 %1885, %v940_v16  }
 0x26a   : > { %1175 = vperm.xlu1 %1886, %v941_v17   ;;  %v2107_v17 = vld [vmem:[%s2325_s19 + $0xa0] sm:$0xff] }
 0x26b   : > { %1180 = vperm.xlu0 %1885, %v942_v18  }
 0x2ab   : > { %v983_v19 = vpop.permute.xlu1 %982 }
 0x2ac   : > { %v978_v20 = vpop.permute.xlu0 %977  ;;  %v2581_v22 = vmul.f32 %v2087_v21, %v983_v19  ;;  %v2584_v24 = vmul.f32 %v2088_v23, %v983_v19  ;;  %v2108_v19 = vld [vmem:[%s2325_s19 + $0xa8] sm:$0xff]  ;;  %v2109_v23 = vld [vmem:[%s2325_s19 + $0xb0] sm:$0xff] }
 0x2ad   : > { %v2587_v26 = vmul.f32 %v2089_v25, %v978_v20  ;;  %v2590_v28 = vmul.f32 %v2090_v27, %v978_v20  ;;  %v2110_v27 = vld [vmem:[%s2325_s19 + $0xb8] sm:$0xff] }
 0x2af   : > { %v988_v29 = vpop.permute.xlu1 %987  ;;  %v1088_v30 = vpack.c.bf16 %v2584_v24, %v2590_v28  ;;  %v1087_v31 = vpack.c.bf16 %v2581_v22, %v2587_v26 }
 0x2b0   : > { %v993_v32 = vpop.permute.xlu0 %992  ;;  %v2597_v34 = vmul.f32 %v2091_v33, %v988_v29  ;;  %v2600_v36 = vmul.f32 %v2092_v35, %v988_v29  ;;  %v2111_v33 = vld [vmem:[%s2325_s19 + $0xc0] sm:$0xff] }
 0x2b1   : > { %v2603_v38 = vmul.f32 %v2093_v37, %v993_v32  ;;  %v2606_v40 = vmul.f32 %v2094_v39, %v993_v32  ;;  %1231 = vmatprep.subr.bf16.mxu0 %v1088_v30  ;;  %1810 = vmatprep.subr.bf16.mxu1 %v1088_v30  ;;  %v2112_v37 = vld [vmem:[%s2325_s19 + $0xc8] sm:$0xff] }
 0x2b2   : > { %1232 = vmatpush1.bf16.msra.mxu0 %v1087_v31  ;;  %1818 = vmatpush1.bf16.msra.mxu1 %v1087_v31 }
 0x2b3   : > { %v1089_v41 = vpack.c.bf16 %v2603_v38, %v2597_v34  ;;  %v1090_v42 = vpack.c.bf16 %v2606_v40, %v2600_v36  ;;  %v998_v43 = vpop.permute.xlu1 %997 }
 0x2b4   : > { %v1003_v44 = vpop.permute.xlu0 %1002  ;;  %v2613_v46 = vmul.f32 %v2095_v45, %v998_v43  ;;  %v2616_v48 = vmul.f32 %v2096_v47, %v998_v43 }
 0x2b5   : > { %v2619_v51 = vmul.f32 %v2097_v50, %v1003_v44  ;;  %v2622_v53 = vmul.f32 %v2098_v52, %v1003_v44  ;;  %1233 = vmatprep.subr.bf16.mxu0 %v1090_v42  ;;  %1811 = vmatprep.subr.bf16.mxu1 %v1090_v42  ;;  %v2113_v42 = vld [vmem:[%s2325_s19 + $0xd0] sm:$0xff]  ;;  %v2114_v44 = vld [vmem:[%s2325_s19 + $0xd8] sm:$0xff] }
 0x2b6   : > { %1234 = vmatpush1.bf16.msra.mxu0 %v1089_v41  ;;  %1819 = vmatpush1.bf16.msra.mxu1 %v1089_v41 }
 0x2b7   : > { %v1091_v54 = vpack.c.bf16 %v2619_v51, %v2613_v46  ;;  %v1092_v55 = vpack.c.bf16 %v2622_v53, %v2616_v48  ;;  %v1008_v56 = vpop.permute.xlu1 %1007 }
 0x2b8   : > { %v2629_v58 = vmul.f32 %v2099_v57, %v1008_v56  ;;  %v2632_v60 = vmul.f32 %v2100_v59, %v1008_v56  ;;  %v2116_v57 = vld [vmem:[%s2325_s19 + $0xe8] sm:$0xff] }
 0x2b9   : > { %1235 = vmatprep.subr.bf16.mxu0 %v1092_v55  ;;  %1812 = vmatprep.subr.bf16.mxu1 %v1092_v55  ;;  %v2115_v55 = vld [vmem:[%s2325_s19 + $0xe0] sm:$0xff] }
 0x2ba   : > { %2935 = vst [vmem:[#allocation7_spill] sm:$0xff] %v2632_v60  ;;  %v1013_v61 = vpop.permute.xlu0 %1012  ;;  %1236 = vmatpush1.bf16.msra.mxu0 %v1091_v54  ;;  %1820 = vmatpush1.bf16.msra.mxu1 %v1091_v54 }
 0x2bb   : > { %v2635_v63 = vmul.f32 %v2101_v62, %v1013_v61  ;;  %v2638_v1 = vmul.f32 %v2102_v0, %v1013_v61  ;;  %v1018_v2 = vpop.permute.xlu1 %1017  ;;  %v2117_v61 = vld [vmem:[%s2325_s19 + $0xf0] sm:$0xff]  ;;  %v2118_v0 = vld [vmem:[%s2325_s19 + $0xf8] sm:$0xff]  ;;  %s307_s19 = sand.u32 1, %s2181_s25  }
 0x2bc   : > { %v2645_v6 = vmul.f32 %v2103_v5, %v1018_v2  ;;  %v2648_v8 = vmul.f32 %v2104_v7, %v1018_v2  ;;  %v1887_v5 = vld [vmem:[%s2923_s5] sm:$0xff]   ;;  %s2767_s8 = sshll.u32 %s307_s19, 8  ;;  %s2872_s20 = scalar_lea.sflag [#allocation5], %s307_s19 }
 0x2bd   : > { %2936 = vst [vmem:[#allocation8_spill] sm:$0xff] %v2635_v63  ;;  %2937 = vst [vmem:[#allocation9_spill] sm:$0xff] %v2638_v1  ;;  %v1093_v3 = vpack.c.bf16 %v2635_v63, %v2629_v58  ;;  %v1094_v4 = vpack.c.bf16 %v2638_v1, %v2632_v60  ;;  %v1888_v7 = vld [vmem:[%s2923_s5 + $0x20] sm:$0xff]   ;;  %s2783_s10 = scalar_lea.vmem [#allocation4], %s2767_s8 }
 0x2be   : > { %v1023_v9 = vpop.permute.xlu0 %1022  ;;  %s1646_s16 = sshll.u32 %s2783_s10, 4  ;;  %s2864_s16 = int_to_ptr.vmem [resolvable:$true] %s1646_s16 }
 0x2bf   : > { %v2651_v11 = vmul.f32 %v2105_v10, %v1023_v9  ;;  %v2654_v13 = vmul.f32 %v2106_v12, %v1023_v9  ;;  %1237 = vmatprep.subr.bf16.mxu0 %v1094_v4  ;;  %1813 = vmatprep.subr.bf16.mxu1 %v1094_v4  ;;  %v1028_v14 = vpop.permute.xlu1 %1027  ;;  %v1889_v9 = vld [vmem:[%s2923_s5 + $0x8] sm:$0xff]   ;;  %v1891_v12 = vld [vmem:[%s2923_s5 + $0x10] sm:$0xff]   ;;  %s2119_s21 = scalar_lea.vmem %s2864_s16, 4096  ;;  %p2126_p1 = scmp.lt.s32.totalorder %s2864_s16, %s2124_s15 }
 0x2c0   : > { %1238 = vmatpush1.bf16.msra.mxu0 %v1093_v3  ;;  %1821 = vmatpush1.bf16.msra.mxu1 %v1093_v3  ;;  %v2661_v18 = vmul.f32 %v2107_v17, %v1028_v14  ;;  %v2664_v20 = vmul.f32 %v2108_v19, %v1028_v14  ;;  %v1890_v10 = vld [vmem:[%s2923_s5 + $0x28] sm:$0xff]   ;;  %v1892_v14 = vld [vmem:[%s2923_s5 + $0x30] sm:$0xff]   ;;  %p2120_p12 = scmp.ne.s32.totalorder %s2864_s16, %s2119_s21  ;;  %p2127_p2 = scmp.lt.s32.totalorder %s2125_s23, %s2119_s21 }
 0x2c1   : > { %v1095_v15 = vpack.c.bf16 %v2651_v11, %v2645_v6  ;;  %v1096_v16 = vpack.c.bf16 %v2654_v13, %v2648_v8 }
 0x2c2   : > { %v1033_v21 = vpop.permute.xlu0 %1032  ;;  %p2121_p13 = pnand %p2120_p12, %p2284_p4  ;;  %p2128_p3 = por %p2127_p2, %p2126_p1 }
 0x2c3   : > { %v2667_v25 = vmul.f32 %v2109_v23, %v1033_v21  ;;  %v2670_v29 = vmul.f32 %v2110_v27, %v1033_v21  ;;  %1239 = vmatprep.subr.bf16.mxu0 %v1096_v16  ;;  %1814 = vmatprep.subr.bf16.mxu1 %v1096_v16  ;;  %v1038_v30 = vpop.permute.xlu1 %1037  ;;  %v1894_v16 = vld [vmem:[%s2923_s5 + $0x38] sm:$0xff]  }
 0x2c4   : > { %1240 = vmatpush1.bf16.msra.mxu0 %v1095_v15  ;;  %1822 = vmatpush1.bf16.msra.mxu1 %v1095_v15  ;;  %v2677_v35 = vmul.f32 %v2111_v33, %v1038_v30  ;;  %v2680_v39 = vmul.f32 %v2112_v37, %v1038_v30  ;;  %v1893_v15 = vld [vmem:[%s2923_s5 + $0x18] sm:$0xff]   ;;  %p2122_p0 = pneg %p2121_p13 }
 0x2c5   : > { %v1097_v31 = vpack.c.bf16 %v2667_v25, %v2661_v18  ;;  %v1098_v32 = vpack.c.bf16 %v2670_v29, %v2664_v20 }
 0x2c6   : > { %v1043_v41 = vpop.permute.xlu0 %1042  ;;  %p2129_p5 = pnand %p2128_p3, %p2122_p0 }
 0x2c7   : > { %v2683_v43 = vmul.f32 %v2113_v42, %v1043_v41  ;;  %v2686_v45 = vmul.f32 %v2114_v44, %v1043_v41  ;;  %1241 = vmatprep.subr.bf16.mxu0 %v1098_v32  ;;  %1815 = vmatprep.subr.bf16.mxu1 %v1098_v32 }
 0x2c8   : > { %1242 = vmatpush1.bf16.msra.mxu0 %v1097_v31  ;;  %1823 = vmatpush1.bf16.msra.mxu1 %v1097_v31 }
 0x2c9   : > { %v1099_v47 = vpack.c.bf16 %v2683_v43, %v2677_v35  ;;  %v1100_v50 = vpack.c.bf16 %v2686_v45, %v2680_v39  ;;  %v1048_v52 = vpop.permute.xlu1 %1047 }
 0x2ca   : > { %v1053_v54 = vpop.permute.xlu0 %1052  ;;  %v2693_v56 = vmul.f32 %v2115_v55, %v1048_v52  ;;  %v2696_v59 = vmul.f32 %v2116_v57, %v1048_v52 }
 0x2cb   : > { %v2699_v62 = vmul.f32 %v2117_v61, %v1053_v54  ;;  %v2702_v2 = vmul.f32 %v2118_v0, %v1053_v54  ;;  %1243 = vmatprep.subr.bf16.mxu0 %v1100_v50  ;;  %1816 = vmatprep.subr.bf16.mxu1 %v1100_v50 }
 0x2cc   : > { %2938 = vst [vmem:[#allocation10_spill] sm:$0xff] %v2693_v56  ;;  %2939 = vst [vmem:[#allocation11_spill] sm:$0xff] %v2696_v59  ;;  %1244 = vmatpush1.bf16.msra.mxu0 %v1099_v47  ;;  %1824 = vmatpush1.bf16.msra.mxu1 %v1099_v47 }
 0x2cd   : > { %2940 = vst [vmem:[#allocation12_spill] sm:$0xff] %v2699_v62  ;;  %2941 = vst [vmem:[#allocation13_spill] sm:$0xff] %v2702_v2  ;;  %v1101_v3 = vpack.c.bf16 %v2699_v62, %v2693_v56  ;;  %v1102_v4 = vpack.c.bf16 %v2702_v2, %v2696_v59  ;;  %v1106_v19 = vpop.permute.xlu1 %1105 }
 0x2ce   : > { %v1111_v17 = vpop.permute.xlu0 %1110 }
 0x2cf   : > { %1245 = vmatprep.subr.bf16.mxu0 %v1102_v4  ;;  %1817 = vmatprep.subr.bf16.mxu1 %v1102_v4 }
 0x2d0   : > { %1246 = vmatpush1.bf16.msra.mxu0 %v1101_v3  ;;  %1825 = vmatpush1.bf16.msra.mxu1 %v1101_v3 }
 0x2d1   : > { %v1116_v23 = vpop.permute.xlu1 %1115 }
 0x2d2   : > { %v2738_v21 = vpop.permute.xlu0 %1120 }
 0x2d3   : > { %1264 = vmatmul.mubr.bf16.vlgmr.msra.gmra.mrb[0].mxu0 %v1887_v5  ;;  %1304 = vmatmul.mubr.bf16.vlgmr.msra.gmra.mrb[0].mxu1 %v1888_v7 }
 0x2d4   : > { %1273 = vmatprep.mubr.bf16.mxu0 %v2200_v49  ;;  %1313 = vmatprep.mubr.bf16.mxu1 %v2200_v49 }
 0x2d5   : > { %v2742_v30 = vpop.permute.xlu1 %1125 }
 0x2d6   : > { %v2740_v27 = vpop.permute.xlu0 %1130 }
 0x2d9   : > { %v2746_v31 = vpop.permute.xlu1 %1135 }
 0x2db   : > { %1274 = vmatmul.mubr.bf16.gmra.mrb[4].mxu0 %v1889_v9  ;;  %1314 = vmatmul.mubr.bf16.gmra.mrb[4].mxu1 %v1890_v10 }
 0x2dc   : > { %1283 = vmatprep.mubr.bf16.mxu0 %v2200_v49  ;;  %1323 = vmatprep.mubr.bf16.mxu1 %v2200_v49 }
 0x2dd   : > { %v1146_v33 = vpop.permute.xlu1 %1145 }
 0x2e3   : > { %1284 = vmatmul.mubr.bf16.gmra.mrb[8].mxu0 %v1891_v12  ;;  %1324 = vmatmul.mubr.bf16.gmra.mrb[8].mxu1 %v1892_v14 }
 0x2e4   : > { %1293 = vmatprep.mubr.bf16.mxu0 %v2200_v49  ;;  %1333 = vmatprep.mubr.bf16.mxu1 %v2200_v49  ;;  %v2744_v49 = vpop.permute.xlu0 %1140 }
 0x2e8   : > { %v1151_v32 = vpop.permute.xlu0 %1150 }
 0x2eb   : > { %1294 = vmatmul.mubr.bf16.gmra.mrb[12].mxu0 %v1893_v15  ;;  %1334 = vmatmul.mubr.bf16.gmra.mrb[12].mxu1 %v1894_v16 }
 0x3a6   : > { %v1265_v37 = vpop.f32.mrb[0].mxu0  ;;  %v1305_v41 = vpop.f32.mrb[0].mxu1 }
 0x3a7   : > { %v1266_v42 = vadd.f32 %v1265_v37, %v1106_v19  ;;  %v1306_v44 = vadd.f32 %v1305_v41, %v1146_v33  ;;  %v1267_v47 = vpop.f32.mrb[1].mxu0  ;;  %v1307_v50 = vpop.f32.mrb[1].mxu1 }
 0x3a8   : > { %v1268_v52 = vadd.f32 %v1267_v47, %v1106_v19  ;;  %v1308_v54 = vadd.f32 %v1307_v50, %v1146_v33  ;;  %v1269_v55 = vpop.f32.mrb[2].mxu0  ;;  %v1309_v57 = vpop.f32.mrb[2].mxu1 }
 0x3a9   : > { %v1770_v61 = vmul.f32 -1.442695, %v1266_v42  ;;  %v1786_v0 = vmul.f32 -1.442695, %v1306_v44  ;;  %v1270_v3 = vadd.f32 %v1269_v55, %v1111_v17  ;;  %v1310_v4 = vadd.f32 %v1309_v57, %v1151_v32  ;;  %v1271_v5 = vpop.f32.mrb[3].mxu0  ;;  %v1311_v7 = vpop.f32.mrb[3].mxu1 }
 0x3aa   : > { %v1771_v9 = vmul.f32 -1.442695, %v1268_v52  ;;  %v1787_v10 = vmul.f32 -1.442695, %v1308_v54  ;;  %v1272_v12 = vadd.f32 %v1271_v5, %v1111_v17  ;;  %v1312_v14 = vadd.f32 %v1311_v7, %v1151_v32  ;;  %v1156_v37 = vpop.permute.xlu1 %1155 }
 0x3ab   : > { %1959 = vpow2.f32 %v1770_v61  ;;  %v1772_v15 = vmul.f32 -1.442695, %v1270_v3  ;;  %v1788_v16 = vmul.f32 -1.442695, %v1310_v4 }
 0x3ac   : > { %1961 = vpow2.f32 %v1786_v0  ;;  %v1773_v19 = vmul.f32 -1.442695, %v1272_v12  ;;  %v1789_v33 = vmul.f32 -1.442695, %v1312_v14 }
 0x3ad   : > { %1963 = vpow2.f32 %v1771_v9 }
 0x3ae   : > { %1965 = vpow2.f32 %v1787_v10  ;;  %v1275_v41 = vpop.f32.mrb[4].mxu0  ;;  %v1315_v42 = vpop.f32.mrb[4].mxu1 }
 0x3af   : > { %1967 = vpow2.f32 %v1772_v15  ;;  %v1276_v44 = vadd.f32 %v1275_v41, %v1116_v23  ;;  %v1316_v47 = vadd.f32 %v1315_v42, %v1156_v37  ;;  %v1277_v50 = vpop.f32.mrb[5].mxu0  ;;  %v1317_v55 = vpop.f32.mrb[5].mxu1 }
 0x3b0   : > { %1969 = vpow2.f32 %v1788_v16  ;;  %v1278_v52 = vadd.f32 %v1277_v50, %v1116_v23  ;;  %v1318_v17 = vadd.f32 %v1317_v55, %v1156_v37  ;;  %v1279_v32 = vpop.f32.mrb[6].mxu0  ;;  %v1319_v54 = vpop.f32.mrb[6].mxu1 }
 0x3b1   : > { %1971 = vpow2.f32 %v1773_v19  ;;  %v1774_v57 = vmul.f32 -1.442695, %v1276_v44  ;;  %v1790_v61 = vmul.f32 -1.442695, %v1316_v47  ;;  %v1280_v0 = vadd.f32 %v1279_v32, %v2738_v21  ;;  %v1281_v3 = vpop.f32.mrb[7].mxu0  ;;  %v1321_v4 = vpop.f32.mrb[7].mxu1 }
 0x3b2   : > { %1973 = vpow2.f32 %v1789_v33  ;;  %v1775_v5 = vmul.f32 -1.442695, %v1278_v52  ;;  %v1791_v7 = vmul.f32 -1.442695, %v1318_v17  ;;  %v1161_v55 = vpop.permute.xlu0 %1160 }
 0x3b3   : > { %1975 = vpow2.f32 %v1774_v57  ;;  %v1776_v9 = vmul.f32 -1.442695, %v1280_v0 }
 0x3b4   : > { %1977 = vpow2.f32 %v1790_v61  ;;  %v1320_v61 = vadd.f32 %v1319_v54, %v1161_v55 }
 0x3b5   : > { %v1960_v10 = vpop.eup %1959  ;;  %1979 = vpow2.f32 %v1775_v5 }
 0x3b6   : > { %v1962_v12 = vpop.eup %1961  ;;  %v1440_v23 = vadd.f32 1.0, %v1960_v10  ;;  %1981 = vpow2.f32 %v1791_v7  ;;  %v1285_v14 = vpop.f32.mrb[8].mxu0  ;;  %v1792_v2 = vmul.f32 -1.442695, %v1320_v61 }
 0x3b7   : > { %v1325_v15 = vpop.f32.mrb[8].mxu1  ;;  %v1964_v16 = vpop.eup %1963  ;;  %v1456_v37 = vadd.f32 1.0, %v1962_v12  ;;  %1983 = vpow2.f32 %v1776_v9  ;;  %v1282_v9 = vadd.f32 %v1281_v3, %v2738_v21 }
 0x3b8   : > { %v1287_v19 = vpop.f32.mrb[9].mxu0  ;;  %v1327_v41 = vpop.f32.mrb[9].mxu1  ;;  %1985 = vrcp.f32 %v1440_v23  ;;  %v1441_v33 = vadd.f32 1.0, %v1964_v16  ;;  %v1322_v23 = vadd.f32 %v1321_v4, %v1161_v55 }
 0x3b9   : > { %v1966_v42 = vpop.eup %1965  ;;  %v1289_v44 = vpop.f32.mrb[10].mxu0  ;;  %1987 = vrcp.f32 %v1456_v37  ;;  %v1777_v3 = vmul.f32 -1.442695, %v1282_v9  ;;  %v1288_v4 = vadd.f32 %v1287_v19, %v2742_v30 }
 0x3ba   : > { %v2749_v47 = vpop.f32.mrb[10].mxu1  ;;  %v1968_v50 = vpop.eup %1967  ;;  %v1457_v52 = vadd.f32 1.0, %v1966_v42  ;;  %1989 = vrcp.f32 %v1441_v33  ;;  %v1286_v33 = vadd.f32 %v1285_v14, %v2742_v30 }
 0x3bb   : > { %v2751_v17 = vpop.f32.mrb[11].mxu0  ;;  %v1970_v32 = vpop.eup %1969  ;;  %v1442_v57 = vadd.f32 1.0, %v1968_v50  ;;  %v1779_v63 = vmul.f32 -1.442695, %v1288_v4 }
 0x3bc   : > { %v2753_v0 = vpop.f32.mrb[11].mxu1  ;;  %v1972_v5 = vpop.eup %1971  ;;  %1991 = vrcp.f32 %v1457_v52  ;;  %v1458_v7 = vadd.f32 1.0, %v1970_v32 }
 0x3bd   : > { %v1974_v10 = vpop.eup %1973  ;;  %1993 = vrcp.f32 %v1442_v57  ;;  %v1443_v12 = vadd.f32 1.0, %v1972_v5  ;;  %v1166_v37 = vpop.permute.xlu1 %1165 }
 0x3be   : > { %v1976_v16 = vpop.eup %1975  ;;  %1995 = vrcp.f32 %v1458_v7  ;;  %v1459_v42 = vadd.f32 1.0, %v1974_v10  ;;  %v1326_v1 = vadd.f32 %v1325_v15, %v1166_v37  ;;  %v1295_v52 = vpop.f32.mrb[12].mxu0  ;;  %v1793_v7 = vmul.f32 -1.442695, %v1322_v23 }
 0x3bf   : > { %v1978_v50 = vpop.eup %1977  ;;  %1997 = vrcp.f32 %v1443_v12  ;;  %v1444_v54 = vadd.f32 1.0, %v1976_v16  ;;  %v1335_v55 = vpop.f32.mrb[12].mxu1  ;;  %v1328_v10 = vadd.f32 %v1327_v41, %v1166_v37  ;;  %v1778_v16 = vmul.f32 -1.442695, %v1286_v33 }
 0x3c0   : > { %v1980_v32 = vpop.eup %1979  ;;  %1999 = vrcp.f32 %v1459_v42  ;;  %v1460_v21 = vadd.f32 1.0, %v1978_v50  ;;  %v2759_v57 = vpop.f32.mrb[13].mxu0  ;;  %v1794_v41 = vmul.f32 -1.442695, %v1326_v1  ;;  %v1290_v37 = vadd.f32 %v1289_v44, %v2740_v27 }
 0x3c1   : > { %v1982_v5 = vpop.eup %1981  ;;  %2001 = vrcp.f32 %v1444_v54  ;;  %v1445_v14 = vadd.f32 1.0, %v1980_v32  ;;  %v2761_v12 = vpop.f32.mrb[13].mxu1  ;;  %v1795_v59 = vmul.f32 -1.442695, %v1328_v10 }
 0x3c2   : > { %v2763_v61 = vpop.f32.mrb[14].mxu0  ;;  %v1984_v15 = vpop.eup %1983  ;;  %2003 = vrcp.f32 %v1460_v21  ;;  %v1461_v9 = vadd.f32 1.0, %v1982_v5 }
 0x3c3   : > { %v2769_v30 = vpop.f32.mrb[14].mxu1  ;;  %v2771_v19 = vpop.f32.mrb[15].mxu0  ;;  %2005 = vrcp.f32 %v1445_v14  ;;  %v1446_v23 = vadd.f32 1.0, %v1984_v15  ;;  %v1292_v14 = vadd.f32 %v2751_v17, %v2740_v27 }
 0x3c4   : > { %v1986_v42 = vpop.eup %1985  ;;  %v1171_v50 = vpop.permute.xlu0 %1170  ;;  %2007 = vrcp.f32 %v1461_v9 }
 0x3c5   : > { %v2774_v54 = vpop.f32.mrb[15].mxu1  ;;  %v1988_v32 = vpop.eup %1987  ;;  %v1536_v62 = vadd.f32 1.0, %v1986_v42  ;;  %v1330_v21 = vadd.f32 %v2749_v47, %v1171_v50  ;;  %2009 = vrcp.f32 %v1446_v23  ;;  %v1332_v60 = vadd.f32 %v2753_v0, %v1171_v50 }
 0x3c6   : > { %v1990_v33 = vpop.eup %1989  ;;  %v1552_v5 = vadd.f32 1.0, %v1988_v32  ;;  %2011 = vpow2.f32 %v1792_v2  ;;  %v1780_v47 = vmul.f32 -1.442695, %v1290_v37  ;;  %v2787_v17 = vpop.permute.xlu1 %1175 }
 0x3c7   : > { %v1992_v15 = vpop.eup %1991  ;;  %v1568_v1 = vmul.f32 %v1536_v62, %v2587_v26  ;;  %v1537_v44 = vadd.f32 1.0, %v1990_v33  ;;  %2013 = vpow2.f32 %v1777_v3  ;;  %v1796_v62 = vmul.f32 -1.442695, %v1330_v21 }
 0x3c8   : > { %v1994_v42 = vpop.eup %1993  ;;  %v1584_v4 = vmul.f32 %v1552_v5, %v2645_v6  ;;  %v1553_v9 = vadd.f32 1.0, %v1992_v15  ;;  %2015 = vpow2.f32 %v1793_v7  ;;  %v1296_v3 = vadd.f32 %v1295_v52, %v2746_v31 }
 0x3c9   : > { %v1996_v56 = vpop.eup %1995  ;;  %1600 = vst [vmem:[%s2783_s10] sm:$0xff] %v1568_v1  ;;  %v1569_v27 = vmul.f32 %v1537_v44, %v2590_v28  ;;  %v1538_v26 = vadd.f32 1.0, %v1994_v42  ;;  %2017 = vpow2.f32 %v1778_v16  ;;  %v1336_v7 = vadd.f32 %v1335_v55, %v2787_v17 }
 0x3ca   : > { %v1998_v2 = vpop.eup %1997  ;;  %1616 = vst [vmem:[%s2783_s10 + $0x80] sm:$0xff] %v1584_v4  ;;  %v1585_v6 = vmul.f32 %v1553_v9, %v2648_v8  ;;  %v1554_v0 = vadd.f32 1.0, %v1996_v56  ;;  %2019 = vpow2.f32 %v1794_v41  ;;  %v1781_v8 = vmul.f32 -1.442695, %v1292_v14 }
 0x3cb   : > { %v2000_v10 = vpop.eup %1999  ;;  %1601 = vst [vmem:[%s2783_s10 + $0x8] sm:$0xff] %v1569_v27  ;;  %v1570_v50 = vmul.f32 %v1538_v26, %v2581_v22  ;;  %v1539_v28 = vadd.f32 1.0, %v1998_v2  ;;  %2021 = vpow2.f32 %v1779_v63  ;;  %v1797_v22 = vmul.f32 -1.442695, %v1332_v60 }
 0x3cc   : > { %v2002_v23 = vpop.eup %2001  ;;  %1617 = vst [vmem:[%s2783_s10 + $0x88] sm:$0xff] %v1585_v6  ;;  %v1586_v37 = vmul.f32 %v1554_v0, %v2651_v11  ;;  %v1555_v32 = vadd.f32 1.0, %v2000_v10  ;;  %2023 = vpow2.f32 %v1795_v59  ;;  %v1782_v11 = vmul.f32 -1.442695, %v1296_v3 }
 0x3cd   : > { %v2004_v56 = vpop.eup %2003  ;;  %1602 = vst [vmem:[%s2783_s10 + $0x10] sm:$0xff] %v1570_v50  ;;  %v1571_v52 = vmul.f32 %v1539_v28, %v2584_v24  ;;  %v1540_v16 = vadd.f32 1.0, %v2002_v23  ;;  %2025 = vpow2.f32 %v1780_v47  ;;  %v1798_v24 = vmul.f32 -1.442695, %v1336_v7 }
 0x3ce   : > { %v2006_v21 = vpop.eup %2005  ;;  %1618 = vst [vmem:[%s2783_s10 + $0x90] sm:$0xff] %v1586_v37  ;;  %v1587_v55 = vmul.f32 %v1555_v32, %v2654_v13  ;;  %v1556_v41 = vadd.f32 1.0, %v2004_v56  ;;  %2027 = vpow2.f32 %v1796_v62  ;;  %v1298_v50 = vadd.f32 %v2759_v57, %v2746_v31  ;;  %v1181_v32 = vpop.permute.xlu0 %1180 }
 0x3cf   : > { %v2008_v33 = vpop.eup %2007  ;;  %1603 = vst [vmem:[%s2783_s10 + $0x18] sm:$0xff] %v1571_v52  ;;  %v1572_v63 = vmul.f32 %v1540_v16, %v2597_v34  ;;  %v1541_v5 = vadd.f32 1.0, %v2006_v21  ;;  %2029 = vpow2.f32 %v1781_v8  ;;  %v1338_v23 = vadd.f32 %v2761_v12, %v2787_v17 }
 0x3d0   : > { %v2010_v14 = vpop.eup %2009  ;;  %1619 = vst [vmem:[%s2783_s10 + $0x98] sm:$0xff] %v1587_v55  ;;  %v1588_v60 = vmul.f32 %v1556_v41, %v2661_v18  ;;  %v1557_v59 = vadd.f32 1.0, %v2008_v33  ;;  %2031 = vpow2.f32 %v1797_v22  ;;  %v1300_v56 = vadd.f32 %v2763_v61, %v2744_v49 }
 0x3d1   : > { %v2012_v13 = vpop.eup %2011  ;;  %1604 = vst [vmem:[%s2783_s10 + $0x20] sm:$0xff] %v1572_v63  ;;  %v1573_v15 = vmul.f32 %v1541_v5, %v2600_v36  ;;  %v1542_v1 = vadd.f32 1.0, %v2010_v14  ;;  %2033 = vpow2.f32 %v1782_v11  ;;  %v1340_v22 = vadd.f32 %v2769_v30, %v1181_v32 }
 0x3d2   : > { %v2014_v44 = vpop.eup %2013  ;;  %1620 = vst [vmem:[%s2783_s10 + $0xa0] sm:$0xff] %v1588_v60  ;;  %v1589_v34 = vmul.f32 %v1557_v59, %v2664_v20  ;;  %v1462_v42 = vadd.f32 1.0, %v2012_v13  ;;  %2035 = vpow2.f32 %v1798_v24  ;;  %v1783_v57 = vmul.f32 -1.442695, %v1298_v50 }
 0x3d3   : > { %v2016_v4 = vpop.eup %2015  ;;  %1605 = vst [vmem:[%s2783_s10 + $0x28] sm:$0xff] %v1573_v15  ;;  %v1574_v18 = vmul.f32 %v1542_v1, %v2603_v38  ;;  %v1447_v9 = vadd.f32 1.0, %v2014_v44  ;;  %v1302_v55 = vadd.f32 %v2771_v19, %v2744_v49  ;;  %v1799_v41 = vmul.f32 -1.442695, %v1338_v23 }
 0x3d4   : > { %v2018_v47 = vpop.eup %2017  ;;  %1621 = vst [vmem:[%s2783_s10 + $0xa8] sm:$0xff] %v1589_v34  ;;  %2037 = vrcp.f32 %v1462_v42  ;;  %v1463_v27 = vadd.f32 1.0, %v2016_v4  ;;  %v1342_v11 = vadd.f32 %v2774_v54, %v1181_v32  ;;  %v1784_v63 = vmul.f32 -1.442695, %v1300_v56 }
 0x3d5   : > { %v2020_v36 = vpop.eup %2019  ;;  %1606 = vst [vmem:[%s2783_s10 + $0x30] sm:$0xff] %v1574_v18  ;;  %2039 = vrcp.f32 %v1447_v9  ;;  %v1448_v26 = vadd.f32 1.0, %v2018_v47  ;;  %v1800_v24 = vmul.f32 -1.442695, %v1340_v22  ;;  %v1785_v19 = vmul.f32 -1.442695, %v1302_v55 }
 0x3d6   : > { %v2022_v62 = vpop.eup %2021  ;;  %2041 = vrcp.f32 %v1463_v27  ;;  %v1464_v2 = vadd.f32 1.0, %v2020_v36  ;;  %v1801_v15 = vmul.f32 -1.442695, %v1342_v11 }
 0x3d7   : > { %v2024_v20 = vpop.eup %2023  ;;  %2043 = vrcp.f32 %v1448_v26  ;;  %v1449_v6 = vadd.f32 1.0, %v2022_v62 }
 0x3d8   : > { %v2026_v0 = vpop.eup %2025  ;;  %2045 = vrcp.f32 %v1464_v2  ;;  %v1465_v3 = vadd.f32 1.0, %v2024_v20 }
 0x3d9   : > { %v2028_v38 = vpop.eup %2027  ;;  %2047 = vrcp.f32 %v1449_v6  ;;  %v1450_v10 = vadd.f32 1.0, %v2026_v0 }
 0x3da   : > { %v2030_v28 = vpop.eup %2029  ;;  %2049 = vrcp.f32 %v1465_v3  ;;  %v1466_v7 = vadd.f32 1.0, %v2028_v38 }
 0x3db   : > { %v2032_v37 = vpop.eup %2031  ;;  %2051 = vrcp.f32 %v1450_v10  ;;  %v1451_v8 = vadd.f32 1.0, %v2030_v28 }
 0x3dc   : > { %v2034_v52 = vpop.eup %2033  ;;  %2053 = vrcp.f32 %v1466_v7  ;;  %v1467_v16 = vadd.f32 1.0, %v2032_v37 }
 0x3dd   : > { %v2036_v21 = vpop.eup %2035  ;;  %2055 = vrcp.f32 %v1451_v8  ;;  %v1452_v31 = vadd.f32 1.0, %v2034_v52 }
 0x3de   : > { %v2038_v12 = vpop.eup %2037  ;;  %2057 = vrcp.f32 %v1467_v16  ;;  %v1468_v17 = vadd.f32 1.0, %v2036_v21 }
 0x3df   : > { %v2040_v33 = vpop.eup %2039  ;;  %v1558_v61 = vadd.f32 1.0, %v2038_v12  ;;  %2059 = vrcp.f32 %v1452_v31 }
 0x3e0   : > { %v2042_v5 = vpop.eup %2041  ;;  %v1543_v30 = vadd.f32 1.0, %v2040_v33  ;;  %2061 = vrcp.f32 %v1468_v17  ;;  %v2943_v17 = vld [vmem:[#allocation7_spill] sm:$0xff] }
 0x3e1   : > { %v2044_v14 = vpop.eup %2043  ;;  %v1590_v60 = vmul.f32 %v1558_v61, %v2667_v25  ;;  %v1559_v49 = vadd.f32 1.0, %v2042_v5  ;;  %2063 = vpow2.f32 %v1783_v57  ;;  %v2944_v61 = vld [vmem:[#allocation11_spill] sm:$0xff] }
 0x3e2   : > { %v2046_v59 = vpop.eup %2045  ;;  %v1575_v54 = vmul.f32 %v1543_v30, %v2606_v40  ;;  %v1544_v13 = vadd.f32 1.0, %v2044_v14  ;;  %2065 = vpow2.f32 %v1799_v41 }
 0x3e3   : > { %v2048_v1 = vpop.eup %2047  ;;  %1622 = vst [vmem:[%s2783_s10 + $0xb0] sm:$0xff] %v1590_v60  ;;  %v1591_v44 = vmul.f32 %v1559_v49, %v2670_v29  ;;  %v1560_v34 = vadd.f32 1.0, %v2046_v59  ;;  %2067 = vpow2.f32 %v1784_v63  ;;  %v2946_v49 = vld [vmem:[#allocation12_spill] sm:$0xff] }
 0x3e4   : > { %v2050_v42 = vpop.eup %2049  ;;  %1607 = vst [vmem:[%s2783_s10 + $0x38] sm:$0xff] %v1575_v54  ;;  %v1576_v25 = vmul.f32 %v1544_v13, %v2613_v46  ;;  %v1545_v4 = vadd.f32 1.0, %v2048_v1  ;;  %2069 = vpow2.f32 %v1800_v24  ;;  %v2945_v24 = vld [vmem:[#allocation8_spill] sm:$0xff]  ;;  %v2947_v54 = vld [vmem:[#allocation9_spill] sm:$0xff] }
 0x3e5   : > { %v2052_v18 = vpop.eup %2051  ;;  %1623 = vst [vmem:[%s2783_s10 + $0xb8] sm:$0xff] %v1591_v44  ;;  %v1592_v40 = vmul.f32 %v1560_v34, %v2677_v35  ;;  %v1561_v9 = vadd.f32 1.0, %v2050_v42  ;;  %2071 = vpow2.f32 %v1785_v19 }
 0x3e6   : > { %v2054_v47 = vpop.eup %2053  ;;  %1608 = vst [vmem:[%s2783_s10 + $0x40] sm:$0xff] %v1576_v25  ;;  %v1577_v29 = vmul.f32 %v1545_v4, %v2616_v48  ;;  %v1546_v27 = vadd.f32 1.0, %v2052_v18  ;;  %2073 = vpow2.f32 %v1801_v15  ;;  %v2948_v15 = vld [vmem:[#allocation13_spill] sm:$0xff] }
 0x3e7   : > { %v2056_v36 = vpop.eup %2055  ;;  %1624 = vst [vmem:[%s2783_s10 + $0xc0] sm:$0xff] %v1592_v40  ;;  %v1593_v46 = vmul.f32 %v1561_v9, %v2680_v39  ;;  %v1562_v26 = vadd.f32 1.0, %v2054_v47 }
 0x3e8   : > { %v2058_v62 = vpop.eup %2057  ;;  %1609 = vst [vmem:[%s2783_s10 + $0x48] sm:$0xff] %v1577_v29  ;;  %v1578_v35 = vmul.f32 %v1546_v27, %v2619_v51  ;;  %v1547_v2 = vadd.f32 1.0, %v2056_v36 }
 0x3e9   : > { %v2060_v20 = vpop.eup %2059  ;;  %1625 = vst [vmem:[%s2783_s10 + $0xc8] sm:$0xff] %v1593_v46  ;;  %v1594_v48 = vmul.f32 %v1562_v26, %v2683_v43  ;;  %v1563_v6 = vadd.f32 1.0, %v2058_v62  ;;  %v2942_v43 = vld [vmem:[#allocation10_spill] sm:$0xff] }
 0x3ea   : > { %v2062_v0 = vpop.eup %2061  ;;  %1610 = vst [vmem:[%s2783_s10 + $0x50] sm:$0xff] %v1578_v35  ;;  %v1579_v3 = vmul.f32 %v1547_v2, %v2622_v53  ;;  %v1548_v38 = vadd.f32 1.0, %v2060_v20 }
 0x3eb   : > { %v2064_v39 = vpop.eup %2063  ;;  %1626 = vst [vmem:[%s2783_s10 + $0xd0] sm:$0xff] %v1594_v48  ;;  %v1595_v10 = vmul.f32 %v1563_v6, %v2686_v45  ;;  %v1564_v50 = vadd.f32 1.0, %v2062_v0 }
 0x3ec   : > { %v2066_v51 = vpop.eup %2065  ;;  %1611 = vst [vmem:[%s2783_s10 + $0x58] sm:$0xff] %v1579_v3  ;;  %v1580_v28 = vmul.f32 %v1548_v38, %v2629_v58  ;;  %v1453_v7 = vadd.f32 1.0, %v2064_v39 }
 0x3ed   : > { %v2068_v23 = vpop.eup %2067  ;;  %1627 = vst [vmem:[%s2783_s10 + $0xd8] sm:$0xff] %v1595_v10  ;;  %v1596_v37 = vmul.f32 %v1564_v50, %v2942_v43  ;;  %v1469_v32 = vadd.f32 1.0, %v2066_v51 }
 0x3ee   : > { %v2070_v8 = vpop.eup %2069  ;;  %1612 = vst [vmem:[%s2783_s10 + $0x60] sm:$0xff] %v1580_v28  ;;  %2075 = vrcp.f32 %v1453_v7  ;;  %v1454_v53 = vadd.f32 1.0, %v2068_v23 }
 0x3ef   : > { %v2072_v56 = vpop.eup %2071  ;;  %1628 = vst [vmem:[%s2783_s10 + $0xe0] sm:$0xff] %v1596_v37  ;;  %2077 = vrcp.f32 %v1469_v32  ;;  %v1470_v52 = vadd.f32 1.0, %v2070_v8 }
 0x3f0   : > { %v2074_v45 = vpop.eup %2073  ;;  %2079 = vrcp.f32 %v1454_v53  ;;  %v1455_v16 = vadd.f32 1.0, %v2072_v56 }
 0x3f1   : > { %2081 = vrcp.f32 %v1470_v52  ;;  %v1471_v58 = vadd.f32 1.0, %v2074_v45 }
 0x3f2   : > { %2083 = vrcp.f32 %v1455_v16 }
 0x3f3   : > { %2085 = vrcp.f32 %v1471_v58 }
 0x3f8   : > { %v2076_v22 = vpop.eup %2075 }
 0x3f9   : > { %v2078_v21 = vpop.eup %2077  ;;  %v1549_v31 = vadd.f32 1.0, %v2076_v22 }
 0x3fa   : > { %v2080_v57 = vpop.eup %2079  ;;  %v1565_v55 = vadd.f32 1.0, %v2078_v21 }
 0x3fb   : > { %v2082_v12 = vpop.eup %2081  ;;  %v1581_v41 = vmul.f32 %v1549_v31, %v2943_v17  ;;  %v1550_v11 = vadd.f32 1.0, %v2080_v57 }
 0x3fc   : > { %v2084_v33 = vpop.eup %2083  ;;  %v1597_v63 = vmul.f32 %v1565_v55, %v2944_v61  ;;  %v1566_v5 = vadd.f32 1.0, %v2082_v12 }
 0x3fd   : > { %v2086_v30 = vpop.eup %2085  ;;  %1613 = vst [vmem:[%s2783_s10 + $0x68] sm:$0xff] %v1581_v41  ;;  %v1582_v14 = vmul.f32 %v1550_v11, %v2945_v24  ;;  %v1551_v60 = vadd.f32 1.0, %v2084_v33 }
 0x3fe   : > { %1629 = vst [vmem:[%s2783_s10 + $0xe8] sm:$0xff] %v1597_v63  ;;  %v1598_v19 = vmul.f32 %v1566_v5, %v2946_v49  ;;  %v1567_v59 = vadd.f32 1.0, %v2086_v30 }
 0x3ff   : > { %1614 = vst [vmem:[%s2783_s10 + $0x70] sm:$0xff] %v1582_v14  ;;  %v1583_v13 = vmul.f32 %v1551_v60, %v2947_v54 }
 0x400   : > { %1630 = vst [vmem:[%s2783_s10 + $0xf0] sm:$0xff] %v1598_v19  ;;  %v1599_v1 = vmul.f32 %v1567_v59, %v2948_v15 }
 0x401   : > { %1615 = vst [vmem:[%s2783_s10 + $0x78] sm:$0xff] %v1583_v13 }
 0x402   : > { %1631 = vst [vmem:[%s2783_s10 + $0xf8] sm:$0xff] %v1599_v1 }
 0x403   : > { %2132 = shalt.err (!%p2129_p5)
}
 0x404   : > { %s2133_s30 = scalar_lea.hbm %s2862_s27, 4096  ;;  %s2137_s10 = scalar_lea.hbm %s2925_s7, 8192 }
 0x405   : > { %p2134_p6 = scmp.ne.s32.totalorder %s2862_s27, %s2133_s30  ;;  %p2138_p10 = scmp.lt.u32.totalorder %s2862_s27, %s2925_s7 }
 0x406   : > { %p2139_p11 = scmp.lt.u32.totalorder %s2137_s10, %s2133_s30  ;;  %p2141_p13 = scmp.lt.u32.totalorder %s2133_s30, %s2862_s27 }
 0x407   : > { %p2135_p7 = pnand %p2134_p6, %p2284_p4 }
 0x408   : > { %p2140_p12 = por %p2139_p11, %p2138_p10 }
 0x409   : > { %p2136_p9 = pneg %p2135_p7 }
 0x40a   : > { %p2142_p0 = por %p2141_p13, %p2140_p12 }
 0x40c   : > { %p2143_p1 = pnand %p2142_p0, %p2136_p9 }
 0x40e   : > { %2146 = shalt.err (!%p2143_p1)
}
 0x40f   : > { %s2202_s18 = smov 256   ;;  %s2203_s21 = smov 16  }
 0x410   : > { %1826 = dma.vmem_to_hbm [thread:$0]  (%p2284_p4), %s2864_s16, 4096, %s2862_s27, %s2872_s20, %s2202_s18, %s2202_s18, %s2203_s21  }
 0x411 PF: > { %p1832_p2 = scmp.ge.s32.totalorder %s2197_s29, 2  ;;  %s1661_s22 = sand.u32 1, %s2177_s24  }
 0x412   : > { %s1662_s15 = scalar_lea.sflag [#allocation5], %s1661_s22 }
 0x413   : > { %p1829_p3 = pnand %p1832_p2, %p2291_p8 }
 0x415   : > { %2172 = dma.done.wait (!%p1829_p3), %s1662_s15, 4096  }
 0x416   : > { %2174 = vsyncadd (!%p1829_p3), %s1662_s15, 4294963200  ;;  %s20_s29 = sadd.s32 1, %s2197_s29   ;;  %s2949_s24 = smov %s2181_s25 }
 0x417   : > { %p17_p5 = scmp.ge.s32.totalorder %s20_s29, 4   ;;  %s2950_s25 = smov %s2185_s26 }
 0x418   : > { %s2951_s26 = smov %s2297_s14  ;;  %s2952_s27 = smov %s2193_s28 }
 0x419   : > { %s2953_s28 = smov %s2955_s9  ;;  %19 = sbr.rel (!%p17_p5) target bundleno = 4 (0x4), region = 95 }
 0x420   :  { %1667 = vsyncpa [#allocation5], 1 }
 0x421   :  { %1669 = vsyncpa [#allocation5 + $0x1], 1 }

</bundles_post_ra>
